<compile_context>
chip_gen: v5e
topology: v5e:2x2
jax: 0.10.0
libtpu: 0.0.40
codegen_flags: <defaults>
</compile_context>

<pallas_src>
import functools

import jax
import jax.numpy as jnp
from jax.experimental import pallas as pl
from jax.experimental.pallas import tpu as pltpu


def _round_up(x, m):
    return ((x + m - 1) // m) * m


def _pick_row_tile(ho, max_tile=8):
    """Largest divisor of ho that is <= max_tile (keeps the f32 accumulator small and
    gives the grid more than one row step for pipelining / megacore)."""
    for th in range(min(ho, max_tile), 0, -1):
        if ho % th == 0:
            return th
    return 1


def _scn_conv2d_kernel(x_ref, w_ref, b_ref, o_ref, acc_ref, *, kh_size, kw_size):
    """One grid step = one (image, output-row-tile) pair.

    x_ref   : (1, Hp, Wp, Cin)     full padded image, bf16 (resident across row tiles)
    w_ref   : (KH*KW, Cin, Coutp)  beta-mixed conv weight, bf16, Coutp % 128 == 0
    b_ref   : (1, Coutp)           beta-mixed bias (zeros if conv has no bias), f32
    o_ref   : (1, TH, Wo, Coutp)   output row tile (lane-dense: Coutp % 128 == 0)
    acc_ref : (TH, Wo, Coutp) f32  VMEM scratch accumulator
    """
    t = pl.program_id(1)
    _, th, wo, coutp = o_ref.shape
    wp = x_ref.shape[2]

    # Start the accumulator at the broadcast bias -- no separate epilogue add.
    acc_ref[...] = jnp.broadcast_to(b_ref[0, :], acc_ref.shape)

    row0 = pl.multiple_of(t * th, th)  # first padded input row for this tile
    for kh in range(kh_size):
        # Row slice along H only (a major dim) -> no sublane-offset relayout copies.
        rows = x_ref[0, pl.ds(row0 + kh, th), :, :]        # (TH, Wp, Cin) bf16
        lhs = rows.reshape(th * wp, rows.shape[-1])        # tile-aligned collapse
        for kw in range(kw_size):
            wk = w_ref[kh * kw_size + kw, :, :]            # (Cin, Coutp) bf16
            # Matmul over the full padded width; MXU accumulates in f32.
            r = jnp.dot(lhs, wk, preferred_element_type=jnp.float32)
            r = r.reshape(th, wp, coutp)
            if kw:
                # Absorb the kw shift with an XLU sublane roll (free-ish slot, no VMEM
                # copy).  Wrapped columns land at w >= Wo and are discarded below.
                r = pltpu.roll(r, shift=wp - kw, axis=1)
            acc_ref[...] += r[:, :wo, :]                   # keep the valid width only

    o_ref[0] = acc_ref[...].astype(o_ref.dtype)


@functools.partial(jax.jit, static_argnames=("stride", "padding"))
def scn_conv2d_forward(x_nchw, weight_list, bias_list, beta, *, stride=1, padding=1):
    """ScnConv2d.forward: conv2d(x, sum_i beta_i*W_i, sum_i beta_i*b_i, stride, pad)."""
    assert stride == 1, "this kernel implements stride=1, dilation=1, groups=1"

    # ---- configuration(): beta-weighted mixture of the d weight/bias copies (glue) ----
    w_oihw = jnp.einsum("d,doihw->oihw", beta, weight_list)     # (Cout, Cin, KH, KW)
    bias = (jnp.einsum("d,dc->c", beta, bias_list)
            if bias_list is not None else None)

    cout, cin, kh_size, kw_size = w_oihw.shape
    n, _, h, w = x_nchw.shape

    hp = h + 2 * padding
    wp = w + 2 * padding
    ho = hp - kh_size + 1                                       # stride 1
    wo = wp - kw_size + 1
    wp_pad = _round_up(wp, 16)          # bf16 sublane packing -> free in-kernel collapse
    coutp = _round_up(cout, 128)        # lane-dense output / MXU-friendly N
    th = _pick_row_tile(ho, 8)          # bounded (TH, Wo, Coutp) f32 accumulator
    num_row_tiles = ho // th

    # ---- weights: OIHW -> (KH*KW, Cin, Coutp) bf16; bias -> (1, Coutp) f32 ----
    w_taps = jnp.transpose(w_oihw, (2, 3, 1, 0)).reshape(kh_size * kw_size, cin, cout)
    w_taps = jnp.pad(w_taps, ((0, 0), (0, 0), (0, coutp - cout))).astype(jnp.bfloat16)
    if bias is None:
        b2d = jnp.zeros((1, coutp), jnp.float32)
    else:
        b2d = jnp.pad(bias.astype(jnp.float32), (0, coutp - cout)).reshape(1, coutp)

    # ---- input: NCHW f32 -> padded NHWC bf16 (transpose+pad+cast fuse to one pass) ----
    x_nhwc = jnp.transpose(x_nchw, (0, 2, 3, 1))
    x_pad = jnp.pad(
        x_nhwc,
        ((0, 0), (padding, padding), (padding, padding + (wp_pad - wp)), (0, 0)),
    ).astype(jnp.bfloat16)

    kernel = functools.partial(_scn_conv2d_kernel, kh_size=kh_size, kw_size=kw_size)

    out_nhwc = pl.pallas_call(
        kernel,
        out_shape=jax.ShapeDtypeStruct((n, ho, wo, coutp), jnp.float32),
        grid_spec=pltpu.PrefetchScalarGridSpec(
            num_scalar_prefetch=0,
            grid=(n, num_row_tiles),
            in_specs=[
                # Full padded image per n; constant along t -> fetched once per image.
                pl.BlockSpec((1, hp, wp_pad, cin), lambda i, t: (i, 0, 0, 0)),
                pl.BlockSpec((kh_size * kw_size, cin, coutp), lambda i, t: (0, 0, 0)),
                pl.BlockSpec((1, coutp), lambda i, t: (0, 0)),
            ],
            out_specs=pl.BlockSpec((1, th, wo, coutp), lambda i, t: (i, t, 0, 0)),
            scratch_shapes=[pltpu.VMEM((th, wo, coutp), jnp.float32)],
        ),
        compiler_params=pltpu.CompilerParams(
            dimension_semantics=("parallel", "parallel"),
            vmem_limit_bytes=32 * 1024 * 1024,
        ),
    )(x_pad, w_taps, b2d)

    # NHWC(Coutp) -> NCHW(Cout): pad-channel slice fuses into the layout transpose.
    return jnp.transpose(out_nhwc[..., :cout], (0, 3, 1, 2))


def _reference_forward(x_nchw, weight_list, bias_list, beta, *, stride=1, padding=1):
    """Pure-JAX f32 reference (NCHW, lax.conv) for correctness checking."""
    w = jnp.einsum("d,doihw->oihw", beta, weight_list)
    y = jax.lax.conv_general_dilated(
        x_nchw, w, window_strides=(stride, stride),
        padding=((padding, padding), (padding, padding)),
        dimension_numbers=("NCHW", "OIHW", "NCHW"))
    if bias_list is not None:
        b = jnp.einsum("d,dc->c", beta, bias_list)
        y = y + b.reshape(1, -1, 1, 1)
    return y


if __name__ == "__main__":
    # Small synthetic config consistent with ScnConv2d(Conv2d(4, 8, k=3, s=1, p=1), d=3).
    N, Cin, H, W = 2, 4, 16, 16
    Cout, K, d = 8, 3, 3

    key = jax.random.PRNGKey(0)
    kx, kw_, kb, kbeta = jax.random.split(key, 4)

    x = jax.random.normal(kx, (N, Cin, H, W), dtype=jnp.float32)
    # d weight/bias copies (OIHW) — synthetic stand-in for the ScnLayer weight_list
    # (which at init holds d clones of the original Conv2d parameters).
    weight_list = 0.1 * jax.random.normal(kw_, (d, Cout, Cin, K, K), dtype=jnp.float32)
    bias_list = 0.1 * jax.random.normal(kb, (d, Cout), dtype=jnp.float32)
    beta = jax.nn.softmax(jax.random.normal(kbeta, (d,), dtype=jnp.float32))

    out = scn_conv2d_forward(x, weight_list, bias_list, beta, stride=1, padding=1)
    out = jax.block_until_ready(out)

    ref = _reference_forward(x, weight_list, bias_list, beta, stride=1, padding=1)
    assert out.shape == (N, Cout, H, W)
    err = float(jnp.max(jnp.abs(out - ref)))
    # bf16 inputs/weights with f32 accumulation -> relaxed tolerance vs the f32 reference.
    assert err < 5e-2, f"mismatch vs JAX reference: max abs err = {err}"

    print("KERNEL_OK")
</pallas_src>

<mosaic_0001>
module attributes {stable_mosaic.version = 11 : i64} {
  func.func @_scn_conv2d_kernel(%arg0: i32, %arg1: i32, %arg2: memref<1x18x32x4xbf16, #tpu.memory_space<vmem>>, %arg3: memref<9x4x128xbf16, #tpu.memory_space<vmem>>, %arg4: memref<1x128xf32, #tpu.memory_space<vmem>>, %arg5: memref<1x8x16x128xf32, #tpu.memory_space<vmem>>, %arg6: memref<8x16x128xf32, #tpu.memory_space<vmem>>) attributes {dimension_semantics = [#tpu.dimension_semantics<parallel>, #tpu.dimension_semantics<parallel>], iteration_bounds = array<i64: 2, 2>, scalar_prefetch = 0 : i64, scratch_operands = 1 : i64, tpu.core_type = #tpu.core_type<tc>, window_params = [{transform_indices = @transform_0, window_bounds = array<i64: 1, 18, 32, 4>}, {pipeline_mode = #tpu.pipeline_mode<synchronous>, transform_indices = @transform_1, window_bounds = array<i64: 9, 4, 128>}, {pipeline_mode = #tpu.pipeline_mode<synchronous>, transform_indices = @transform_2, window_bounds = array<i64: 1, 128>}, {transform_indices = @transform_3, window_bounds = array<i64: 1, 8, 16, 128>}]} {
    %c0 = arith.constant 0 : index
    %c0_0 = arith.constant 0 : index
    %0 = vector.load %arg4[%c0, %c0_0] : memref<1x128xf32, #tpu.memory_space<vmem>>, vector<1x128xf32>
    %1 = vector.shape_cast %0 : vector<1x128xf32> to vector<128xf32>
    %2 = vector.shape_cast %1 : vector<128xf32> to vector<1x1x128xf32>
    %3 = vector.broadcast %2 : vector<1x1x128xf32> to vector<8x16x128xf32>
    %c0_1 = arith.constant 0 : index
    %c0_2 = arith.constant 0 : index
    %c0_3 = arith.constant 0 : index
    %4 = vector.load %arg6[%c0_1, %c0_2, %c0_3] : memref<8x16x128xf32, #tpu.memory_space<vmem>>, vector<8x16x128xf32>
    tpu.vector_store %arg6[%c0_1, %c0_2, %c0_3], %3 {strides = array<i32>} : memref<8x16x128xf32, #tpu.memory_space<vmem>>, vector<8x16x128xf32>,
    %c8_i32 = arith.constant 8 : i32
    %5 = arith.muli %arg1, %c8_i32 : i32
    %6 = tpu.assume_multiple %5, 8 : i32
    %c0_i32 = arith.constant 0 : i32
    %7 = arith.addi %6, %c0_i32 : i32
    %c0_4 = arith.constant 0 : index
    %8 = arith.index_cast %7 : i32 to index
    %c0_5 = arith.constant 0 : index
    %c0_6 = arith.constant 0 : index
    %9 = vector.load %arg2[%c0_4, %8, %c0_5, %c0_6] : memref<1x18x32x4xbf16, #tpu.memory_space<vmem>>, vector<1x8x32x4xbf16>
    %10 = vector.shape_cast %9 : vector<1x8x32x4xbf16> to vector<8x32x4xbf16>
    %11 = vector.shape_cast %10 : vector<8x32x4xbf16> to vector<256x4xbf16>
    %c0_7 = arith.constant 0 : index
    %c0_8 = arith.constant 0 : index
    %c0_9 = arith.constant 0 : index
    %12 = vector.load %arg3[%c0_7, %c0_8, %c0_9] : memref<9x4x128xbf16, #tpu.memory_space<vmem>>, vector<1x4x128xbf16>
    %13 = vector.shape_cast %12 : vector<1x4x128xbf16> to vector<4x128xbf16>
    %cst = arith.constant dense<0.000000e+00> : vector<256x128xf32>
    %14 = tpu.matmul %11, %13, %cst {dimension_numbers = #tpu.dot_dimension_numbers<[1], [0], [0], [1], [0, 0, 1, 1], [], []>} : vector<256x4xbf16>, vector<4x128xbf16>, vector<256x128xf32> -> vector<256x128xf32>
    %15 = vector.shape_cast %14 : vector<256x128xf32> to vector<8x32x128xf32>
    %c0_10 = arith.constant 0 : index
    %c0_11 = arith.constant 0 : index
    %c0_12 = arith.constant 0 : index
    %16 = vector.load %arg6[%c0_10, %c0_11, %c0_12] : memref<8x16x128xf32, #tpu.memory_space<vmem>>, vector<8x16x128xf32>
    %17 = vector.extract_strided_slice %15 {offsets = [0, 0, 0], sizes = [8, 16, 128], strides = [1, 1, 1]} : vector<8x32x128xf32> to vector<8x16x128xf32>
    %18 = arith.addf %16, %17 : vector<8x16x128xf32>
    %c0_13 = arith.constant 0 : index
    %c0_14 = arith.constant 0 : index
    %c0_15 = arith.constant 0 : index
    %19 = vector.load %arg6[%c0_13, %c0_14, %c0_15] : memref<8x16x128xf32, #tpu.memory_space<vmem>>, vector<8x16x128xf32>
    tpu.vector_store %arg6[%c0_13, %c0_14, %c0_15], %18 {strides = array<i32>} : memref<8x16x128xf32, #tpu.memory_space<vmem>>, vector<8x16x128xf32>,
    %c1 = arith.constant 1 : index
    %c0_16 = arith.constant 0 : index
    %c0_17 = arith.constant 0 : index
    %20 = vector.load %arg3[%c1, %c0_16, %c0_17] : memref<9x4x128xbf16, #tpu.memory_space<vmem>>, vector<1x4x128xbf16>
    %21 = vector.shape_cast %20 : vector<1x4x128xbf16> to vector<4x128xbf16>
    %cst_18 = arith.constant dense<0.000000e+00> : vector<256x128xf32>
    %22 = tpu.matmul %11, %21, %cst_18 {dimension_numbers = #tpu.dot_dimension_numbers<[1], [0], [0], [1], [0, 0, 1, 1], [], []>} : vector<256x4xbf16>, vector<4x128xbf16>, vector<256x128xf32> -> vector<256x128xf32>
    %23 = vector.shape_cast %22 : vector<256x128xf32> to vector<8x32x128xf32>
    %c31_i32 = arith.constant 31 : i32
    %24 = tpu.dynamic_rotate %23 by %c31_i32 dim 1 : vector<8x32x128xf32>, i32 -> vector<8x32x128xf32>
    %c0_19 = arith.constant 0 : index
    %c0_20 = arith.constant 0 : index
    %c0_21 = arith.constant 0 : index
    %25 = vector.load %arg6[%c0_19, %c0_20, %c0_21] : memref<8x16x128xf32, #tpu.memory_space<vmem>>, vector<8x16x128xf32>
    %26 = vector.extract_strided_slice %24 {offsets = [0, 0, 0], sizes = [8, 16, 128], strides = [1, 1, 1]} : vector<8x32x128xf32> to vector<8x16x128xf32>
    %27 = arith.addf %25, %26 : vector<8x16x128xf32>
    %c0_22 = arith.constant 0 : index
    %c0_23 = arith.constant 0 : index
    %c0_24 = arith.constant 0 : index
    %28 = vector.load %arg6[%c0_22, %c0_23, %c0_24] : memref<8x16x128xf32, #tpu.memory_space<vmem>>, vector<8x16x128xf32>
    tpu.vector_store %arg6[%c0_22, %c0_23, %c0_24], %27 {strides = array<i32>} : memref<8x16x128xf32, #tpu.memory_space<vmem>>, vector<8x16x128xf32>,
    %c2 = arith.constant 2 : index
    %c0_25 = arith.constant 0 : index
    %c0_26 = arith.constant 0 : index
    %29 = vector.load %arg3[%c2, %c0_25, %c0_26] : memref<9x4x128xbf16, #tpu.memory_space<vmem>>, vector<1x4x128xbf16>
    %30 = vector.shape_cast %29 : vector<1x4x128xbf16> to vector<4x128xbf16>
    %cst_27 = arith.constant dense<0.000000e+00> : vector<256x128xf32>
    %31 = tpu.matmul %11, %30, %cst_27 {dimension_numbers = #tpu.dot_dimension_numbers<[1], [0], [0], [1], [0, 0, 1, 1], [], []>} : vector<256x4xbf16>, vector<4x128xbf16>, vector<256x128xf32> -> vector<256x128xf32>
    %32 = vector.shape_cast %31 : vector<256x128xf32> to vector<8x32x128xf32>
    %c30_i32 = arith.constant 30 : i32
    %33 = tpu.dynamic_rotate %32 by %c30_i32 dim 1 : vector<8x32x128xf32>, i32 -> vector<8x32x128xf32>
    %c0_28 = arith.constant 0 : index
    %c0_29 = arith.constant 0 : index
    %c0_30 = arith.constant 0 : index
    %34 = vector.load %arg6[%c0_28, %c0_29, %c0_30] : memref<8x16x128xf32, #tpu.memory_space<vmem>>, vector<8x16x128xf32>
    %35 = vector.extract_strided_slice %33 {offsets = [0, 0, 0], sizes = [8, 16, 128], strides = [1, 1, 1]} : vector<8x32x128xf32> to vector<8x16x128xf32>
    %36 = arith.addf %34, %35 : vector<8x16x128xf32>
    %c0_31 = arith.constant 0 : index
    %c0_32 = arith.constant 0 : index
    %c0_33 = arith.constant 0 : index
    %37 = vector.load %arg6[%c0_31, %c0_32, %c0_33] : memref<8x16x128xf32, #tpu.memory_space<vmem>>, vector<8x16x128xf32>
    tpu.vector_store %arg6[%c0_31, %c0_32, %c0_33], %36 {strides = array<i32>} : memref<8x16x128xf32, #tpu.memory_space<vmem>>, vector<8x16x128xf32>,
    %c1_i32 = arith.constant 1 : i32
    %38 = arith.addi %6, %c1_i32 : i32
    %c0_34 = arith.constant 0 : index
    %39 = arith.index_cast %38 : i32 to index
    %c0_35 = arith.constant 0 : index
    %c0_36 = arith.constant 0 : index
    %40 = vector.load %arg2[%c0_34, %39, %c0_35, %c0_36] : memref<1x18x32x4xbf16, #tpu.memory_space<vmem>>, vector<1x8x32x4xbf16>
    %41 = vector.shape_cast %40 : vector<1x8x32x4xbf16> to vector<8x32x4xbf16>
    %42 = vector.shape_cast %41 : vector<8x32x4xbf16> to vector<256x4xbf16>
    %c3 = arith.constant 3 : index
    %c0_37 = arith.constant 0 : index
    %c0_38 = arith.constant 0 : index
    %43 = vector.load %arg3[%c3, %c0_37, %c0_38] : memref<9x4x128xbf16, #tpu.memory_space<vmem>>, vector<1x4x128xbf16>
    %44 = vector.shape_cast %43 : vector<1x4x128xbf16> to vector<4x128xbf16>
    %cst_39 = arith.constant dense<0.000000e+00> : vector<256x128xf32>
    %45 = tpu.matmul %42, %44, %cst_39 {dimension_numbers = #tpu.dot_dimension_numbers<[1], [0], [0], [1], [0, 0, 1, 1], [], []>} : vector<256x4xbf16>, vector<4x128xbf16>, vector<256x128xf32> -> vector<256x128xf32>
    %46 = vector.shape_cast %45 : vector<256x128xf32> to vector<8x32x128xf32>
    %c0_40 = arith.constant 0 : index
    %c0_41 = arith.constant 0 : index
    %c0_42 = arith.constant 0 : index
    %47 = vector.load %arg6[%c0_40, %c0_41, %c0_42] : memref<8x16x128xf32, #tpu.memory_space<vmem>>, vector<8x16x128xf32>
    %48 = vector.extract_strided_slice %46 {offsets = [0, 0, 0], sizes = [8, 16, 128], strides = [1, 1, 1]} : vector<8x32x128xf32> to vector<8x16x128xf32>
    %49 = arith.addf %47, %48 : vector<8x16x128xf32>
    %c0_43 = arith.constant 0 : index
    %c0_44 = arith.constant 0 : index
    %c0_45 = arith.constant 0 : index
    %50 = vector.load %arg6[%c0_43, %c0_44, %c0_45] : memref<8x16x128xf32, #tpu.memory_space<vmem>>, vector<8x16x128xf32>
    tpu.vector_store %arg6[%c0_43, %c0_44, %c0_45], %49 {strides = array<i32>} : memref<8x16x128xf32, #tpu.memory_space<vmem>>, vector<8x16x128xf32>,
    %c4 = arith.constant 4 : index
    %c0_46 = arith.constant 0 : index
    %c0_47 = arith.constant 0 : index
    %51 = vector.load %arg3[%c4, %c0_46, %c0_47] : memref<9x4x128xbf16, #tpu.memory_space<vmem>>, vector<1x4x128xbf16>
    %52 = vector.shape_cast %51 : vector<1x4x128xbf16> to vector<4x128xbf16>
    %cst_48 = arith.constant dense<0.000000e+00> : vector<256x128xf32>
    %53 = tpu.matmul %42, %52, %cst_48 {dimension_numbers = #tpu.dot_dimension_numbers<[1], [0], [0], [1], [0, 0, 1, 1], [], []>} : vector<256x4xbf16>, vector<4x128xbf16>, vector<256x128xf32> -> vector<256x128xf32>
    %54 = vector.shape_cast %53 : vector<256x128xf32> to vector<8x32x128xf32>
    %c31_i32_49 = arith.constant 31 : i32
    %55 = tpu.dynamic_rotate %54 by %c31_i32_49 dim 1 : vector<8x32x128xf32>, i32 -> vector<8x32x128xf32>
    %c0_50 = arith.constant 0 : index
    %c0_51 = arith.constant 0 : index
    %c0_52 = arith.constant 0 : index
    %56 = vector.load %arg6[%c0_50, %c0_51, %c0_52] : memref<8x16x128xf32, #tpu.memory_space<vmem>>, vector<8x16x128xf32>
    %57 = vector.extract_strided_slice %55 {offsets = [0, 0, 0], sizes = [8, 16, 128], strides = [1, 1, 1]} : vector<8x32x128xf32> to vector<8x16x128xf32>
    %58 = arith.addf %56, %57 : vector<8x16x128xf32>
    %c0_53 = arith.constant 0 : index
    %c0_54 = arith.constant 0 : index
    %c0_55 = arith.constant 0 : index
    %59 = vector.load %arg6[%c0_53, %c0_54, %c0_55] : memref<8x16x128xf32, #tpu.memory_space<vmem>>, vector<8x16x128xf32>
    tpu.vector_store %arg6[%c0_53, %c0_54, %c0_55], %58 {strides = array<i32>} : memref<8x16x128xf32, #tpu.memory_space<vmem>>, vector<8x16x128xf32>,
    %c5 = arith.constant 5 : index
    %c0_56 = arith.constant 0 : index
    %c0_57 = arith.constant 0 : index
    %60 = vector.load %arg3[%c5, %c0_56, %c0_57] : memref<9x4x128xbf16, #tpu.memory_space<vmem>>, vector<1x4x128xbf16>
    %61 = vector.shape_cast %60 : vector<1x4x128xbf16> to vector<4x128xbf16>
    %cst_58 = arith.constant dense<0.000000e+00> : vector<256x128xf32>
    %62 = tpu.matmul %42, %61, %cst_58 {dimension_numbers = #tpu.dot_dimension_numbers<[1], [0], [0], [1], [0, 0, 1, 1], [], []>} : vector<256x4xbf16>, vector<4x128xbf16>, vector<256x128xf32> -> vector<256x128xf32>
    %63 = vector.shape_cast %62 : vector<256x128xf32> to vector<8x32x128xf32>
    %c30_i32_59 = arith.constant 30 : i32
    %64 = tpu.dynamic_rotate %63 by %c30_i32_59 dim 1 : vector<8x32x128xf32>, i32 -> vector<8x32x128xf32>
    %c0_60 = arith.constant 0 : index
    %c0_61 = arith.constant 0 : index
    %c0_62 = arith.constant 0 : index
    %65 = vector.load %arg6[%c0_60, %c0_61, %c0_62] : memref<8x16x128xf32, #tpu.memory_space<vmem>>, vector<8x16x128xf32>
    %66 = vector.extract_strided_slice %64 {offsets = [0, 0, 0], sizes = [8, 16, 128], strides = [1, 1, 1]} : vector<8x32x128xf32> to vector<8x16x128xf32>
    %67 = arith.addf %65, %66 : vector<8x16x128xf32>
    %c0_63 = arith.constant 0 : index
    %c0_64 = arith.constant 0 : index
    %c0_65 = arith.constant 0 : index
    %68 = vector.load %arg6[%c0_63, %c0_64, %c0_65] : memref<8x16x128xf32, #tpu.memory_space<vmem>>, vector<8x16x128xf32>
    tpu.vector_store %arg6[%c0_63, %c0_64, %c0_65], %67 {strides = array<i32>} : memref<8x16x128xf32, #tpu.memory_space<vmem>>, vector<8x16x128xf32>,
    %c2_i32 = arith.constant 2 : i32
    %69 = arith.addi %6, %c2_i32 : i32
    %c0_66 = arith.constant 0 : index
    %70 = arith.index_cast %69 : i32 to index
    %c0_67 = arith.constant 0 : index
    %c0_68 = arith.constant 0 : index
    %71 = vector.load %arg2[%c0_66, %70, %c0_67, %c0_68] : memref<1x18x32x4xbf16, #tpu.memory_space<vmem>>, vector<1x8x32x4xbf16>
    %72 = vector.shape_cast %71 : vector<1x8x32x4xbf16> to vector<8x32x4xbf16>
    %73 = vector.shape_cast %72 : vector<8x32x4xbf16> to vector<256x4xbf16>
    %c6 = arith.constant 6 : index
    %c0_69 = arith.constant 0 : index
    %c0_70 = arith.constant 0 : index
    %74 = vector.load %arg3[%c6, %c0_69, %c0_70] : memref<9x4x128xbf16, #tpu.memory_space<vmem>>, vector<1x4x128xbf16>
    %75 = vector.shape_cast %74 : vector<1x4x128xbf16> to vector<4x128xbf16>
    %cst_71 = arith.constant dense<0.000000e+00> : vector<256x128xf32>
    %76 = tpu.matmul %73, %75, %cst_71 {dimension_numbers = #tpu.dot_dimension_numbers<[1], [0], [0], [1], [0, 0, 1, 1], [], []>} : vector<256x4xbf16>, vector<4x128xbf16>, vector<256x128xf32> -> vector<256x128xf32>
    %77 = vector.shape_cast %76 : vector<256x128xf32> to vector<8x32x128xf32>
    %c0_72 = arith.constant 0 : index
    %c0_73 = arith.constant 0 : index
    %c0_74 = arith.constant 0 : index
    %78 = vector.load %arg6[%c0_72, %c0_73, %c0_74] : memref<8x16x128xf32, #tpu.memory_space<vmem>>, vector<8x16x128xf32>
    %79 = vector.extract_strided_slice %77 {offsets = [0, 0, 0], sizes = [8, 16, 128], strides = [1, 1, 1]} : vector<8x32x128xf32> to vector<8x16x128xf32>
    %80 = arith.addf %78, %79 : vector<8x16x128xf32>
    %c0_75 = arith.constant 0 : index
    %c0_76 = arith.constant 0 : index
    %c0_77 = arith.constant 0 : index
    %81 = vector.load %arg6[%c0_75, %c0_76, %c0_77] : memref<8x16x128xf32, #tpu.memory_space<vmem>>, vector<8x16x128xf32>
    tpu.vector_store %arg6[%c0_75, %c0_76, %c0_77], %80 {strides = array<i32>} : memref<8x16x128xf32, #tpu.memory_space<vmem>>, vector<8x16x128xf32>,
    %c7 = arith.constant 7 : index
    %c0_78 = arith.constant 0 : index
    %c0_79 = arith.constant 0 : index
    %82 = vector.load %arg3[%c7, %c0_78, %c0_79] : memref<9x4x128xbf16, #tpu.memory_space<vmem>>, vector<1x4x128xbf16>
    %83 = vector.shape_cast %82 : vector<1x4x128xbf16> to vector<4x128xbf16>
    %cst_80 = arith.constant dense<0.000000e+00> : vector<256x128xf32>
    %84 = tpu.matmul %73, %83, %cst_80 {dimension_numbers = #tpu.dot_dimension_numbers<[1], [0], [0], [1], [0, 0, 1, 1], [], []>} : vector<256x4xbf16>, vector<4x128xbf16>, vector<256x128xf32> -> vector<256x128xf32>
    %85 = vector.shape_cast %84 : vector<256x128xf32> to vector<8x32x128xf32>
    %c31_i32_81 = arith.constant 31 : i32
    %86 = tpu.dynamic_rotate %85 by %c31_i32_81 dim 1 : vector<8x32x128xf32>, i32 -> vector<8x32x128xf32>
    %c0_82 = arith.constant 0 : index
    %c0_83 = arith.constant 0 : index
    %c0_84 = arith.constant 0 : index
    %87 = vector.load %arg6[%c0_82, %c0_83, %c0_84] : memref<8x16x128xf32, #tpu.memory_space<vmem>>, vector<8x16x128xf32>
    %88 = vector.extract_strided_slice %86 {offsets = [0, 0, 0], sizes = [8, 16, 128], strides = [1, 1, 1]} : vector<8x32x128xf32> to vector<8x16x128xf32>
    %89 = arith.addf %87, %88 : vector<8x16x128xf32>
    %c0_85 = arith.constant 0 : index
    %c0_86 = arith.constant 0 : index
    %c0_87 = arith.constant 0 : index
    %90 = vector.load %arg6[%c0_85, %c0_86, %c0_87] : memref<8x16x128xf32, #tpu.memory_space<vmem>>, vector<8x16x128xf32>
    tpu.vector_store %arg6[%c0_85, %c0_86, %c0_87], %89 {strides = array<i32>} : memref<8x16x128xf32, #tpu.memory_space<vmem>>, vector<8x16x128xf32>,
    %c8 = arith.constant 8 : index
    %c0_88 = arith.constant 0 : index
    %c0_89 = arith.constant 0 : index
    %91 = vector.load %arg3[%c8, %c0_88, %c0_89] : memref<9x4x128xbf16, #tpu.memory_space<vmem>>, vector<1x4x128xbf16>
    %92 = vector.shape_cast %91 : vector<1x4x128xbf16> to vector<4x128xbf16>
    %cst_90 = arith.constant dense<0.000000e+00> : vector<256x128xf32>
    %93 = tpu.matmul %73, %92, %cst_90 {dimension_numbers = #tpu.dot_dimension_numbers<[1], [0], [0], [1], [0, 0, 1, 1], [], []>} : vector<256x4xbf16>, vector<4x128xbf16>, vector<256x128xf32> -> vector<256x128xf32>
    %94 = vector.shape_cast %93 : vector<256x128xf32> to vector<8x32x128xf32>
    %c30_i32_91 = arith.constant 30 : i32
    %95 = tpu.dynamic_rotate %94 by %c30_i32_91 dim 1 : vector<8x32x128xf32>, i32 -> vector<8x32x128xf32>
    %c0_92 = arith.constant 0 : index
    %c0_93 = arith.constant 0 : index
    %c0_94 = arith.constant 0 : index
    %96 = vector.load %arg6[%c0_92, %c0_93, %c0_94] : memref<8x16x128xf32, #tpu.memory_space<vmem>>, vector<8x16x128xf32>
    %97 = vector.extract_strided_slice %95 {offsets = [0, 0, 0], sizes = [8, 16, 128], strides = [1, 1, 1]} : vector<8x32x128xf32> to vector<8x16x128xf32>
    %98 = arith.addf %96, %97 : vector<8x16x128xf32>
    %c0_95 = arith.constant 0 : index
    %c0_96 = arith.constant 0 : index
    %c0_97 = arith.constant 0 : index
    %99 = vector.load %arg6[%c0_95, %c0_96, %c0_97] : memref<8x16x128xf32, #tpu.memory_space<vmem>>, vector<8x16x128xf32>
    tpu.vector_store %arg6[%c0_95, %c0_96, %c0_97], %98 {strides = array<i32>} : memref<8x16x128xf32, #tpu.memory_space<vmem>>, vector<8x16x128xf32>,
    %c0_98 = arith.constant 0 : index
    %c0_99 = arith.constant 0 : index
    %c0_100 = arith.constant 0 : index
    %100 = vector.load %arg6[%c0_98, %c0_99, %c0_100] : memref<8x16x128xf32, #tpu.memory_space<vmem>>, vector<8x16x128xf32>
    %c0_101 = arith.constant 0 : index
    %c0_102 = arith.constant 0 : index
    %c0_103 = arith.constant 0 : index
    %c0_104 = arith.constant 0 : index
    %101 = vector.load %arg5[%c0_101, %c0_102, %c0_103, %c0_104] : memref<1x8x16x128xf32, #tpu.memory_space<vmem>>, vector<1x8x16x128xf32>
    %102 = vector.shape_cast %101 : vector<1x8x16x128xf32> to vector<8x16x128xf32>
    %103 = vector.shape_cast %100 : vector<8x16x128xf32> to vector<1x8x16x128xf32>
    tpu.vector_store %arg5[%c0_101, %c0_102, %c0_103, %c0_104], %103 {strides = array<i32>} : memref<1x8x16x128xf32, #tpu.memory_space<vmem>>, vector<1x8x16x128xf32>,
    return
  }
  func.func @transform_0(%arg0: i32, %arg1: i32) -> (i32, i32, i32, i32) {
    %c0_i32 = arith.constant 0 : i32
    %c0_i32_0 = arith.constant 0 : i32
    %c0_i32_1 = arith.constant 0 : i32
    %c0_i32_2 = arith.constant 0 : i32
    return %arg0, %c0_i32, %c0_i32_0, %c0_i32_1 : i32, i32, i32, i32
  }
  func.func @transform_1(%arg0: i32, %arg1: i32) -> (i32, i32, i32) {
    %c0_i32 = arith.constant 0 : i32
    %c0_i32_0 = arith.constant 0 : i32
    %c0_i32_1 = arith.constant 0 : i32
    %c0_i32_2 = arith.constant 0 : i32
    return %c0_i32, %c0_i32_0, %c0_i32_1 : i32, i32, i32
  }
  func.func @transform_2(%arg0: i32, %arg1: i32) -> (i32, i32) {
    %c0_i32 = arith.constant 0 : i32
    %c0_i32_0 = arith.constant 0 : i32
    %c0_i32_1 = arith.constant 0 : i32
    return %c0_i32, %c0_i32_0 : i32, i32
  }
  func.func @transform_3(%arg0: i32, %arg1: i32) -> (i32, i32, i32, i32) {
    %c0_i32 = arith.constant 0 : i32
    %c0_i32_0 = arith.constant 0 : i32
    %c0_i32_1 = arith.constant 0 : i32
    return %arg0, %arg1, %c0_i32, %c0_i32_0 : i32, i32, i32, i32
  }
}

</mosaic_0001>

<bundles_post_ra>
// kernel: scn_conv2d_forward.1
= control target key start
LH: loop header
LB: loop body
LE: loop exit
PB: predicated region body
PF: predicated region fallthrough
CT: control target
= control target key end

     0   :  { %s2852_s12 = smov 0   ;;  %s2854_s13 = smov 0   ;;  %s3612_s0 = inlined_call_operand.vmem [shape: bf16[2,18,32,4], index: 0, kind: input, shape index: {}]   ;;  %s3613_s1 = inlined_call_operand.vmem [shape: bf16[9,4,128], index: 1, kind: input, shape index: {}]   ;;  %s3614_s2 = inlined_call_operand.vmem [shape: f32[1,128], index: 2, kind: input, shape index: {}]   ;;  %s3615_s3 = inlined_call_operand.vmem [shape: f32[2,16,16,128], index: 3, kind: output, shape index: {}]  }
   0x1   :  { %s2856_s14 = smov 0   ;;  %s2858_s15 = smov 0  }
   0x2   :  { %s2860_s16 = smov 0  }
   0x3 LB: > { %s22_s17 = sadd.s32 1, %s2822_s14  ;;  %s25_s18 = sadd.s32 1, %s2826_s15  ;;  %s2830_s16 = sphi %s2860_s16, %s13_s16   ;;  %s2826_s15 = sphi %s2858_s15, %s3619_s15   ;;  %s2822_s14 = sphi %s2856_s14, %s3618_s14   ;;  %s2818_s13 = sphi %s2854_s13, %s3617_s13   ;;  %s2814_s12 = sphi %s2852_s12, %s3616_s12  }
   0x4   : > { %p23_p0 = scmp.ge.s32.totalorder %s22_s17, 2  ;;  %p2272_p1 = scmp.ge.s32.totalorder %s2830_s16, 1 }
   0x5   : > { %p151_p2 = scmp.lt.s32.totalorder %s2830_s16, 5 }
   0x6   : > { %s3621_s17 = smov (%p23_p0, %s22_s17), 0  ;;  %s3623_s18 = smov (!%p23_p0, %s25_s18), %s2826_s15 }
   0x7   : > { %p152_p3 = pnand %p2272_p1, %p151_p2  ;;  %p27_p4 = scmp.ge.s32.totalorder %s3623_s18, 2 }
   0x8   : > { %p180_p5 = scmp.lt.s32.totalorder (!%p152_p3), %s2818_s13, 1  ;;  %s2696_s30 = sshll.u32 (!%p152_p3), %s2814_s12, 7 }
   0x9   : > { %s3625_s18 = smov (%p27_p4, %s3623_s18), 0  ;;  %155 = sbr.rel (%p152_p3) target bundleno = 724 (0x2d4), region = 32 }
   0xa   : > { %s2274_s25 = sshll.u32 (!%p152_p3), %s2814_s12, 3 }
   0xb   : > { %p188_p6 = scmp.lt.s32.totalorder (!%p152_p3), %s2274_s25, 15 }
   0xe   : > { %v253_v0 = vld [vmem:[%s3613_s1] sm:$0x3]  ;;  %vm383_vm0 = vcmask 1041408   ;;  %v2378_v2 = vld [vmem:[%s3613_s1 + $0x4] sm:$0x3]  ;;  %s3627_s13 = smov (!%p180_p5, %s2818_s13), 1 }
   0xf   : > { %v385_v1 = vsel %vm383_vm0, %v253_v0, 0  ;;  %v2429_v3 = vld [vmem:[%s3613_s1 + $0x6] sm:$0x3]  ;;  %v688_v4 = vsel %vm383_vm0, %v2378_v2, 0  ;;  %v2361_v6 = vld [vmem:[%s3613_s1 + $0x2] sm:$0x3] }
  0x10   : > { %394 = vmatpush.bf16.msra.mxu0 %v385_v1  ;;  %2747 = vmatpush.bf16.msra.mxu1 %v385_v1  ;;  %v1027_v5 = vsel %vm383_vm0, %v2429_v3, 0  ;;  %v511_v7 = vsel %vm383_vm0, %v2361_v6, 0  ;;  %v2510_v8 = vld [vmem:[%s3613_s1 + $0x8] sm:$0x3]  ;;  %s2750_s29 = smul.u32 288, %s3627_s13  ;;  %vm334_vm1 = vcmask 31744  }
  0x11   : > { %2748 = vmatpush.bf16.msra.mxu2 %v385_v1  ;;  %2749 = vmatpush.bf16.msra.mxu3 %v385_v1  ;;  %v1153_v9 = vsel %vm383_vm0, %v2510_v8, 0  ;;  %v2578_v22 = vld [vmem:[%s3613_s1 + $0xc] sm:$0x3]  ;;  %v2659_v23 = vld [vmem:[%s3613_s1 + $0xe] sm:$0x3]  ;;  %s3629_s25 = smov (!%p188_p6, %s2274_s25), 15 }
  0x12   : > { %s184_s6 = scalar_lea.vmem %s3612_s0, %s2750_s29  ;;  %v2527_v24 = vld [vmem:[%s3613_s1 + $0xa] sm:$0x3]  ;;  %v1665_v25 = vsel %vm383_vm0, %v2578_v22, 0  ;;  %v1791_v26 = vsel %vm383_vm0, %v2659_v23, 0  ;;  %v2676_v28 = vld [vmem:[%s3613_s1 + $0x10] sm:$0x3] }
  0x13   : > { %s2911_s7 = scalar_lea.vmem %s184_s6, %s2696_s30  ;;  %v1327_v27 = vsel %vm383_vm0, %v2527_v24, 0  ;;  %v1965_v29 = vsel %vm383_vm0, %v2676_v28, 0  ;;  %v3036_v38 = vld [vmem:[%s3614_s2] ss:$0 sm:$0xff]  ;;  %s2275_s12 = sshll.u32 %s3629_s25, 1 }
  0x14   : > { %520 = vmatpush.bf16.msrb.mxu1 %v511_v7  ;;  %1162 = vmatpush.bf16.msrb.mxu0 %v1153_v9  ;;  %v2697_v10 = vld [vmem:[%s2911_s7] sm:$0xff]  ;;  %v2698_v14 = vld [vmem:[%s2911_s7 + $0x8] sm:$0xff]  ;;  %v2699_v18 = vld [vmem:[%s2911_s7 + $0x10] sm:$0xff]  ;;  %s2276_s26 = sshll.u32 %s3627_s13, 5 }
  0x15   : > { %697 = vmatpush.bf16.msrb.mxu2 %v688_v4  ;;  %1036 = vmatpush.bf16.msrb.mxu3 %v1027_v5  ;;  %v2915_v11 = vld [vmem:[%s2911_s7 + $0x20] sm:$0xff]  ;;  %v2932_v15 = vld [vmem:[%s2911_s7 + $0x28] sm:$0xff]  ;;  %v2949_v19 = vld [vmem:[%s2911_s7 + $0x30] sm:$0xff]  ;;  %s192_s27 = sadd.s32 %s2276_s26, %s2275_s12 }
  0x16   : > { %v2918_v12 = vld [vmem:[%s2911_s7 + $0x40] sm:$0xff]  ;;  %2345 = vmatmul.msk.bf16.vlgmr.msra.gmra.mxu0 %vm334_vm1, %v2697_v10  ;;  %2349 = vmatmul.msk.bf16.vlgmr.msra.gmra.mxu1 %vm334_vm1, %v2915_v11  ;;  %v2935_v16 = vld [vmem:[%s2911_s7 + $0x48] sm:$0xff]  ;;  %v2952_v20 = vld [vmem:[%s2911_s7 + $0x50] sm:$0xff]  ;;  %s2277_s28 = sshll.u32 %s192_s27, 3 }
  0x17   : > { %v2921_v13 = vld [vmem:[%s2911_s7 + $0x60] sm:$0xff]  ;;  %2353 = vmatmul.msk.bf16.vlgmr.msra.gmra.mxu2 %vm334_vm1, %v2918_v12  ;;  %v2938_v17 = vld [vmem:[%s2911_s7 + $0x68] sm:$0xff]  ;;  %v2955_v21 = vld [vmem:[%s2911_s7 + $0x70] sm:$0xff]  ;;  %s3438_s30 = scalar_lea.vmem %s3615_s3, %s2277_s28 }
  0x18   : > { %2357 = vmatmul.msk.bf16.vlgmr.msra.gmra.mxu3 %vm334_vm1, %v2921_v13  ;;  %1336 = vmatpush.bf16.msra.mxu1 %v1327_v27  ;;  %v2700_v30 = vld [vmem:[%s2911_s7 + $0x18] sm:$0xff]  ;;  %v2998_v34 = vld [vmem:[%s2911_s7 + $0x10] sm:$0xff]  ;;  %v3016_v36 = vld [vmem:[%s2911_s7 + $0x20] sm:$0xff] }
  0x19   : > { %1674 = vmatpush.bf16.msra.mxu2 %v1665_v25  ;;  %1800 = vmatpush.bf16.msra.mxu3 %v1791_v26  ;;  %v2982_v31 = vld [vmem:[%s2911_s7 + $0x38] sm:$0xff]  ;;  %v3025_v37 = vld [vmem:[%s2911_s7 + $0x28] sm:$0xff]  ;;  %v3039_v39 = vld [vmem:[%s2911_s7 + $0x30] sm:$0xff] }
  0x1a   : > { %1974 = vmatpush.bf16.msra.mxu0 %v1965_v29  ;;  %v2985_v32 = vld [vmem:[%s2911_s7 + $0x58] sm:$0xff]  ;;  %v3083_v63 = vld [vmem:[%s2911_s7 + $0x40] sm:$0xff]  ;;  %v3127_v29 = vld [vmem:[%s2911_s7 + $0x50] sm:$0xff] }
  0x1b   : > { %v2988_v33 = vld [vmem:[%s2911_s7 + $0x78] sm:$0xff] }
  0x1c   : > { %v3007_v35 = vld [vmem:[%s2911_s7 + $0x18] sm:$0xff] }
  0x1d   : > { %v3066_v52 = vld [vmem:[%s2911_s7 + $0x38] sm:$0xff] }
  0x26   : > { %2346 = vmatmul.msk.bf16.gmra.mxu0 %vm334_vm1, %v2698_v14  ;;  %2350 = vmatmul.msk.bf16.gmra.mxu1 %vm334_vm1, %v2932_v15 }
  0x27   : > { %2354 = vmatmul.msk.bf16.gmra.mxu2 %vm334_vm1, %v2935_v16 }
  0x28   : > { %2358 = vmatmul.msk.bf16.gmra.mxu3 %vm334_vm1, %v2938_v17 }
  0x36   : > { %2347 = vmatmul.msk.bf16.gmra.mxu0 %vm334_vm1, %v2699_v18  ;;  %2351 = vmatmul.msk.bf16.gmra.mxu1 %vm334_vm1, %v2949_v19 }
  0x37   : > { %2355 = vmatmul.msk.bf16.gmra.mxu2 %vm334_vm1, %v2952_v20 }
  0x38   : > { %2359 = vmatmul.msk.bf16.gmra.mxu3 %vm334_vm1, %v2955_v21 }
  0x46   : > { %2348 = vmatmul.msk.bf16.gmra.mxu0 %vm334_vm1, %v2700_v30  ;;  %2352 = vmatmul.msk.bf16.gmra.mxu1 %vm334_vm1, %v2982_v31 }
  0x47   : > { %2356 = vmatmul.msk.bf16.gmra.mxu2 %vm334_vm1, %v2985_v32 }
  0x48   : > { %2360 = vmatmul.msk.bf16.gmra.mxu3 %vm334_vm1, %v2988_v33 }
  0x56   : > { %2362 = vmatmul.msk.bf16.vlgmr.msrb.gmra.mxu1 %vm334_vm1, %v2697_v10  ;;  %2511 = vmatmul.msk.bf16.vlgmr.msrb.gmra.mxu0 %vm334_vm1, %v2998_v34 }
  0x57   : > { %2379 = vmatmul.msk.bf16.vlgmr.msrb.gmra.mxu2 %vm334_vm1, %v2697_v10 }
  0x58   : > { %2494 = vmatmul.msk.bf16.vlgmr.msrb.gmra.mxu3 %vm334_vm1, %v2998_v34 }
  0x66   : > { %2363 = vmatmul.msk.bf16.gmra.mxu1 %vm334_vm1, %v2698_v14  ;;  %2512 = vmatmul.msk.bf16.gmra.mxu0 %vm334_vm1, %v3007_v35 }
  0x67   : > { %2380 = vmatmul.msk.bf16.gmra.mxu2 %vm334_vm1, %v2698_v14  ;;  %v3110_v14 = vld [vmem:[%s2911_s7 + $0x48] sm:$0xff] }
  0x68   : > { %2495 = vmatmul.msk.bf16.gmra.mxu3 %vm334_vm1, %v3007_v35 }
  0x76   : > { %2364 = vmatmul.msk.bf16.gmra.mxu1 %vm334_vm1, %v2699_v18  ;;  %2513 = vmatmul.msk.bf16.gmra.mxu0 %vm334_vm1, %v3016_v36 }
  0x77   : > { %2381 = vmatmul.msk.bf16.gmra.mxu2 %vm334_vm1, %v2699_v18 }
  0x78   : > { %2496 = vmatmul.msk.bf16.gmra.mxu3 %vm334_vm1, %v3016_v36 }
  0x86   : > { %2365 = vmatmul.msk.bf16.gmra.mxu1 %vm334_vm1, %v2700_v30  ;;  %2514 = vmatmul.msk.bf16.gmra.mxu0 %vm334_vm1, %v3025_v37 }
  0x87   : > { %2382 = vmatmul.msk.bf16.gmra.mxu2 %vm334_vm1, %v2700_v30 }
  0x88   : > { %2497 = vmatmul.msk.bf16.gmra.mxu3 %vm334_vm1, %v3025_v37 }
  0x93   : > { %v3041_v40 = vpop.f32.mrf.mxu0  ;;  %v412_v41 = vpop.f32.mrf.mxu1 }
  0x94   : > { %v3044_v42 = vadd.f32 %v3036_v38, %v412_v41 }
  0x96   : > { %2366 = vmatmul.msk.bf16.gmra.mxu1 %vm334_vm1, %v2915_v11  ;;  %2515 = vmatmul.msk.bf16.gmra.mxu0 %vm334_vm1, %v3039_v39 }
  0x97   : > { %2383 = vmatmul.msk.bf16.gmra.mxu2 %vm334_vm1, %v2915_v11 }
  0x98   : > { %2498 = vmatmul.msk.bf16.gmra.mxu3 %vm334_vm1, %v3039_v39 }
  0x9a   : > { %v428_v43 = vpop.f32.mrf.mxu2 }
  0x9b   : > { %v444_v44 = vpop.f32.mrf.mxu3  ;;  %v3055_v45 = vadd.f32 %v3036_v38, %v428_v43  ;;  %v3060_v47 = vpop.f32.mrf.mxu0  ;;  %v618_v43 = vlaneseq }
  0x9c   : > { %v3058_v46 = vadd.f32 %v3036_v38, %v444_v44  ;;  %v414_v48 = vpop.f32.mrf.mxu1 }
  0x9d   : > { %v3063_v49 = vadd.f32 %v3036_v38, %v414_v48 }
  0xa2   : > { %v430_v50 = vpop.f32.mrf.mxu2 }
  0xa3   : > { %v446_v51 = vpop.f32.mrf.mxu3  ;;  %v3069_v53 = vadd.f32 %v3036_v38, %v430_v50  ;;  %v401_v55 = vpop.f32.mrf.mxu0 }
  0xa4   : > { %v3072_v54 = vadd.f32 %v3036_v38, %v446_v51  ;;  %v417_v56 = vpop.f32.mrf.mxu1 }
  0xa6   : > { %2367 = vmatmul.msk.bf16.gmra.mxu1 %vm334_vm1, %v2932_v15  ;;  %2516 = vmatmul.msk.bf16.gmra.mxu0 %vm334_vm1, %v3066_v52 }
  0xa7   : > { %2384 = vmatmul.msk.bf16.gmra.mxu2 %vm334_vm1, %v2932_v15 }
  0xa8   : > { %2499 = vmatmul.msk.bf16.gmra.mxu3 %vm334_vm1, %v3066_v52 }
  0xaa   : > { %v433_v57 = vpop.f32.mrf.mxu2 }
  0xab   : > { %v449_v58 = vpop.f32.mrf.mxu3  ;;  %v402_v59 = vpop.f32.mrf.mxu0 }
  0xac   : > { %v418_v60 = vpop.f32.mrf.mxu1  ;;  %v476_v59 = vadd.f32 %v3036_v38, %v3041_v40  ;;  %v477_v40 = vadd.f32 %v3036_v38, %v3060_v47 }
  0xb2   : > { %v434_v61 = vpop.f32.mrf.mxu2 }
  0xb3   : > { %v450_v62 = vpop.f32.mrf.mxu3  ;;  %v3085_v0 = vpop.f32.mrf.mxu0 }
  0xb4   : > { %v420_v1 = vpop.f32.mrf.mxu1 }
  0xb5   : > { %v3088_v2 = vadd.f32 %v3036_v38, %v420_v1 }
  0xb6   : > { %2368 = vmatmul.msk.bf16.gmra.mxu1 %vm334_vm1, %v2949_v19  ;;  %2517 = vmatmul.msk.bf16.gmra.mxu0 %vm334_vm1, %v3083_v63 }
  0xb7   : > { %2385 = vmatmul.msk.bf16.gmra.mxu2 %vm334_vm1, %v2949_v19 }
  0xb8   : > { %2500 = vmatmul.msk.bf16.gmra.mxu3 %vm334_vm1, %v3083_v63 }
  0xba   : > { %v436_v3 = vpop.f32.mrf.mxu2 }
  0xbb   : > { %v452_v4 = vpop.f32.mrf.mxu3  ;;  %v3099_v5 = vadd.f32 %v3036_v38, %v436_v3  ;;  %v3104_v7 = vpop.f32.mrf.mxu0  ;;  %v3148_v3 = vld [vmem:[%s2911_s7 + $0x58] sm:$0xff] }
  0xbc   : > { %v3102_v6 = vadd.f32 %v3036_v38, %v452_v4  ;;  %v422_v8 = vpop.f32.mrf.mxu1 }
  0xbd   : > { %v3107_v9 = vadd.f32 %v3036_v38, %v422_v8 }
  0xc2   : > { %v438_v10 = vpop.f32.mrf.mxu2 }
  0xc3   : > { %v454_v11 = vpop.f32.mrf.mxu3  ;;  %v3113_v15 = vadd.f32 %v3036_v38, %v438_v10  ;;  %v409_v19 = vpop.f32.mrf.mxu0 }
  0xc4   : > { %v3116_v18 = vadd.f32 %v3036_v38, %v454_v11  ;;  %v425_v22 = vpop.f32.mrf.mxu1 }
  0xc6   : > { %2369 = vmatmul.msk.bf16.gmra.mxu1 %vm334_vm1, %v2982_v31  ;;  %2518 = vmatmul.msk.bf16.gmra.mxu0 %vm334_vm1, %v3110_v14 }
  0xc7   : > { %2386 = vmatmul.msk.bf16.gmra.mxu2 %vm334_vm1, %v2982_v31  ;;  %v3137_v31 = vshrl.u32 %v618_v43, 7 }
  0xc8   : > { %2501 = vmatmul.msk.bf16.gmra.mxu3 %vm334_vm1, %v3110_v14 }
  0xc9   : > { %vm620_vm2 = vcmp.lt.s32.totalorder %v3137_v31, 7  ;;  %vm795_vm3 = vcmp.lt.s32.totalorder %v3137_v31, 6 }
  0xca   : > { %v441_v23 = vpop.f32.mrf.mxu2 }
  0xcb   : > { %v457_v24 = vpop.f32.mrf.mxu3  ;;  %v410_v25 = vpop.f32.mrf.mxu0 }
  0xcc   : > { %v426_v26 = vpop.f32.mrf.mxu1 }
  0xd2   : > { %v442_v27 = vpop.f32.mrf.mxu2 }
  0xd3   : > { %v458_v28 = vpop.f32.mrf.mxu3  ;;  %v1164_v41 = vpop.f32.mrf.mxu0 }
  0xd4   : > { %v522_v30 = vpop.f32.mrf.mxu1  ;;  %v1236_v56 = vrot.slane %v1164_v41, 1 }
  0xd5   : > { %v594_v55 = vrot.slane %v522_v30, 1 }
  0xd6   : > { %2370 = vmatmul.msk.bf16.gmra.mxu1 %vm334_vm1, %v2918_v12  ;;  %2519 = vmatmul.msk.bf16.gmra.mxu0 %vm334_vm1, %v3127_v29 }
  0xd7   : > { %2387 = vmatmul.msk.bf16.gmra.mxu2 %vm334_vm1, %v2918_v12 }
  0xd8   : > { %2502 = vmatmul.msk.bf16.gmra.mxu3 %vm334_vm1, %v3127_v29 }
  0xda   : > { %v699_v44 = vpop.f32.mrf.mxu2 }
  0xdb   : > { %v1038_v48 = vpop.f32.mrf.mxu3  ;;  %v1166_v51 = vpop.f32.mrf.mxu0  ;;  %v771_v4 = vrot.slane %v699_v44, 2 }
  0xdc   : > { %v524_v50 = vpop.f32.mrf.mxu1  ;;  %v1244_v58 = vrot.slane %v1166_v51, 1 }
  0xdd   : > { %v602_v57 = vrot.slane %v524_v50, 1 }
  0xde   : > { %v1268_v60 = vsel %vm620_vm2, %v1236_v56, %v1244_v58 }
  0xdf   : > { %v629_v12 = vsel %vm620_vm2, %v594_v55, %v602_v57 }
  0xe0   : > { %v653_v61 = vadd.f32 %v629_v12, %v476_v59  ;;  %v3171_v59 = vld [vmem:[%s2911_s7 + $0x60] sm:$0xff] }
  0xe2   : > { %v701_v62 = vpop.f32.mrf.mxu2 }
  0xe3   : > { %v1040_v1 = vpop.f32.mrf.mxu3  ;;  %v779_v8 = vrot.slane %v701_v62, 2  ;;  %v1169_v11 = vpop.f32.mrf.mxu0 }
  0xe4   : > { %v527_v10 = vpop.f32.mrf.mxu1  ;;  %v1252_v22 = vrot.slane %v1169_v11, 1 }
  0xe5   : > { %v610_v19 = vrot.slane %v527_v10, 1  ;;  %v804_v23 = vsel %vm795_vm3, %v771_v4, %v779_v8 }
  0xe6   : > { %v828_v24 = vadd.f32 %v804_v23, %v653_v61  ;;  %v1260_v26 = vsel %vm620_vm2, %v1244_v58, %v1252_v22  ;;  %2371 = vmatmul.msk.bf16.gmra.mxu1 %vm334_vm1, %v2935_v16  ;;  %2520 = vmatmul.msk.bf16.gmra.mxu0 %vm334_vm1, %v3148_v3 }
  0xe7   : > { %v621_v25 = vsel %vm620_vm2, %v602_v57, %v610_v19  ;;  %2388 = vmatmul.msk.bf16.gmra.mxu2 %vm334_vm1, %v2935_v16  ;;  %v478_v19 = vadd.f32 %v3036_v38, %v3085_v0  ;;  %v479_v0 = vadd.f32 %v3036_v38, %v3104_v7 }
  0xe8   : > { %v654_v27 = vadd.f32 %v621_v25, %v477_v40  ;;  %2503 = vmatmul.msk.bf16.gmra.mxu3 %vm334_vm1, %v3148_v3  ;;  %v1118_v47 = vadd.f32 %v1038_v48, %v828_v24  ;;  %v3190_v25 = vld [vmem:[%s2911_s7 + $0x68] sm:$0xff] }
  0xea   : > { %v704_v28 = vpop.f32.mrf.mxu2  ;;  %v3166_v41 = vadd.f32 %v1268_v60, %v1118_v47 }
  0xeb   : > { %v1043_v30 = vpop.f32.mrf.mxu3  ;;  %v787_v43 = vrot.slane %v704_v28, 2  ;;  %v1171_v50 = vpop.f32.mrf.mxu0 }
  0xec   : > { %v529_v44 = vpop.f32.mrf.mxu1 }
  0xed   : > { %v796_v51 = vsel %vm795_vm3, %v779_v8, %v787_v43 }
  0xee   : > { %v829_v55 = vadd.f32 %v796_v51, %v654_v27 }
  0xf0   : > { %v1119_v56 = vadd.f32 %v1040_v1, %v829_v55 }
  0xf2   : > { %v706_v57 = vpop.f32.mrf.mxu2  ;;  %v3173_v16 = vadd.f32 %v1260_v26, %v1119_v56 }
  0xf3   : > { %v1044_v58 = vpop.f32.mrf.mxu3  ;;  %v1173_v48 = vpop.f32.mrf.mxu0 }
  0xf4   : > { %v531_v12 = vpop.f32.mrf.mxu1  ;;  %v1237_v8 = vrot.slane %v1173_v48, 1 }
  0xf5   : > { %v595_v4 = vrot.slane %v531_v12, 1 }
  0xf6   : > { %2372 = vmatmul.msk.bf16.gmra.mxu1 %vm334_vm1, %v2952_v20  ;;  %2521 = vmatmul.msk.bf16.gmra.mxu0 %vm334_vm1, %v3171_v59 }
  0xf7   : > { %2389 = vmatmul.msk.bf16.gmra.mxu2 %vm334_vm1, %v2952_v20 }
  0xf8   : > { %2504 = vmatmul.msk.bf16.gmra.mxu3 %vm334_vm1, %v3171_v59 }
  0xfa   : > { %v708_v60 = vpop.f32.mrf.mxu2 }
  0xfb   : > { %v1046_v61 = vpop.f32.mrf.mxu3  ;;  %v1175_v1 = vpop.f32.mrf.mxu0  ;;  %v772_v26 = vrot.slane %v708_v60, 2 }
  0xfc   : > { %v533_v62 = vpop.f32.mrf.mxu1  ;;  %v1245_v11 = vrot.slane %v1175_v1, 1 }
  0xfd   : > { %v603_v10 = vrot.slane %v533_v62, 1 }
  0xfe   : > { %v1269_v20 = vsel %vm620_vm2, %v1237_v8, %v1245_v11 }
  0xff   : > { %v630_v22 = vsel %vm620_vm2, %v595_v4, %v603_v10 }
 0x100   : > { %v655_v40 = vadd.f32 %v630_v22, %v478_v19 }
 0x102   : > { %v710_v23 = vpop.f32.mrf.mxu2 }
 0x103   : > { %v1048_v24 = vpop.f32.mrf.mxu3  ;;  %v780_v27 = vrot.slane %v710_v23, 2  ;;  %v1178_v28 = vpop.f32.mrf.mxu0 }
 0x104   : > { %v536_v47 = vpop.f32.mrf.mxu1  ;;  %v1253_v43 = vrot.slane %v1178_v28, 1 }
 0x105   : > { %v611_v30 = vrot.slane %v536_v47, 1  ;;  %v805_v44 = vsel %vm795_vm3, %v772_v26, %v780_v27 }
 0x106   : > { %v830_v50 = vadd.f32 %v805_v44, %v655_v40  ;;  %v1261_v55 = vsel %vm620_vm2, %v1245_v11, %v1253_v43  ;;  %2373 = vmatmul.msk.bf16.gmra.mxu1 %vm334_vm1, %v2985_v32  ;;  %2522 = vmatmul.msk.bf16.gmra.mxu0 %vm334_vm1, %v3190_v25  ;;  %v3213_v11 = vld [vmem:[%s2911_s7 + $0x70] sm:$0xff]  ;;  %v3231_v44 = vld [vmem:[%s2911_s7 + $0x78] sm:$0xff] }
 0x107   : > { %v622_v51 = vsel %vm620_vm2, %v603_v10, %v611_v30  ;;  %2390 = vmatmul.msk.bf16.gmra.mxu2 %vm334_vm1, %v2985_v32 }
 0x108   : > { %v656_v56 = vadd.f32 %v622_v51, %v479_v0  ;;  %2505 = vmatmul.msk.bf16.gmra.mxu3 %vm334_vm1, %v3190_v25  ;;  %v1120_v38 = vadd.f32 %v1046_v61, %v830_v50 }
 0x10a   : > { %v713_v7 = vpop.f32.mrf.mxu2  ;;  %v3208_v58 = vadd.f32 %v1269_v20, %v1120_v38 }
 0x10b   : > { %v1051_v57 = vpop.f32.mrf.mxu3  ;;  %v788_v12 = vrot.slane %v713_v7, 2  ;;  %v1180_v60 = vpop.f32.mrf.mxu0 }
 0x10c   : > { %v538_v48 = vpop.f32.mrf.mxu1 }
 0x10d   : > { %v797_v62 = vsel %vm795_vm3, %v780_v27, %v788_v12 }
 0x10e   : > { %v831_v1 = vadd.f32 %v797_v62, %v656_v56 }
 0x110   : > { %v1121_v4 = vadd.f32 %v1048_v24, %v831_v1 }
 0x112   : > { %v715_v8 = vpop.f32.mrf.mxu2  ;;  %v3215_v32 = vadd.f32 %v1261_v55, %v1121_v4 }
 0x113   : > { %v1052_v10 = vpop.f32.mrf.mxu3  ;;  %v1182_v61 = vpop.f32.mrf.mxu0 }
 0x114   : > { %v540_v19 = vpop.f32.mrf.mxu1  ;;  %v1238_v26 = vrot.slane %v1182_v61, 1 }
 0x115   : > { %v596_v24 = vrot.slane %v540_v19, 1 }
 0x116   : > { %2374 = vmatmul.msk.bf16.gmra.mxu1 %vm334_vm1, %v2921_v13  ;;  %2523 = vmatmul.msk.bf16.gmra.mxu0 %vm334_vm1, %v3213_v11 }
 0x117   : > { %2391 = vmatmul.msk.bf16.gmra.mxu2 %vm334_vm1, %v2921_v13 }
 0x118   : > { %2506 = vmatmul.msk.bf16.gmra.mxu3 %vm334_vm1, %v3213_v11 }
 0x11a   : > { %v717_v22 = vpop.f32.mrf.mxu2 }
 0x11b   : > { %v1054_v20 = vpop.f32.mrf.mxu3  ;;  %v1184_v23 = vpop.f32.mrf.mxu0  ;;  %v773_v50 = vrot.slane %v717_v22, 2 }
 0x11c   : > { %v542_v40 = vpop.f32.mrf.mxu1  ;;  %v1246_v47 = vrot.slane %v1184_v23, 1 }
 0x11d   : > { %v604_v27 = vrot.slane %v542_v40, 1 }
 0x11e   : > { %v1270_v30 = vsel %vm620_vm2, %v1238_v26, %v1246_v47  ;;  %v3253_v26 = vld [vmem:[%s2911_s7 + $0x80] sm:$0xff] }
 0x11f   : > { %v631_v28 = vsel %vm620_vm2, %v596_v24, %v604_v27 }
 0x120   : > { %v657_v43 = vadd.f32 %v631_v28, %v3044_v42 }
 0x122   : > { %v719_v13 = vpop.f32.mrf.mxu2 }
 0x123   : > { %v1056_v0 = vpop.f32.mrf.mxu3  ;;  %v781_v51 = vrot.slane %v719_v13, 2  ;;  %v1187_v56 = vpop.f32.mrf.mxu0 }
 0x124   : > { %v545_v55 = vpop.f32.mrf.mxu1  ;;  %v1254_v7 = vrot.slane %v1187_v56, 1 }
 0x125   : > { %v612_v38 = vrot.slane %v545_v55, 1  ;;  %v806_v57 = vsel %vm795_vm3, %v773_v50, %v781_v51 }
 0x126   : > { %v832_v12 = vadd.f32 %v806_v57, %v657_v43  ;;  %v1262_v42 = vsel %vm620_vm2, %v1246_v47, %v1254_v7  ;;  %2375 = vmatmul.msk.bf16.gmra.mxu1 %vm334_vm1, %v2938_v17  ;;  %2524 = vmatmul.msk.bf16.gmra.mxu0 %vm334_vm1, %v3231_v44  ;;  %v3271_v57 = vld [vmem:[%s2911_s7 + $0x88] sm:$0xff] }
 0x127   : > { %v623_v48 = vsel %vm620_vm2, %v604_v27, %v612_v38  ;;  %2392 = vmatmul.msk.bf16.gmra.mxu2 %vm334_vm1, %v2938_v17 }
 0x128   : > { %v658_v60 = vadd.f32 %v623_v48, %v3063_v49  ;;  %2507 = vmatmul.msk.bf16.gmra.mxu3 %vm334_vm1, %v3231_v44  ;;  %v1122_v62 = vadd.f32 %v1054_v20, %v832_v12 }
 0x12a   : > { %v722_v1 = vpop.f32.mrf.mxu2  ;;  %v3248_v8 = vadd.f32 %v1270_v30, %v1122_v62 }
 0x12b   : > { %v1059_v4 = vpop.f32.mrf.mxu3  ;;  %v789_v10 = vrot.slane %v722_v1, 2  ;;  %v1189_v61 = vpop.f32.mrf.mxu0 }
 0x12c   : > { %v547_v19 = vpop.f32.mrf.mxu1 }
 0x12d   : > { %v798_v22 = vsel %vm795_vm3, %v781_v51, %v789_v10 }
 0x12e   : > { %v833_v40 = vadd.f32 %v798_v22, %v658_v60 }
 0x130   : > { %v1123_v23 = vadd.f32 %v1056_v0, %v833_v40 }
 0x132   : > { %v724_v49 = vpop.f32.mrf.mxu2  ;;  %v3255_v17 = vadd.f32 %v1262_v42, %v1123_v23 }
 0x133   : > { %v1060_v24 = vpop.f32.mrf.mxu3  ;;  %v1191_v20 = vpop.f32.mrf.mxu0 }
 0x134   : > { %v549_v27 = vpop.f32.mrf.mxu1  ;;  %v1239_v0 = vrot.slane %v1191_v20, 1 }
 0x135   : > { %v597_v13 = vrot.slane %v549_v27, 1 }
 0x136   : > { %2376 = vmatmul.msk.bf16.gmra.mxu1 %vm334_vm1, %v2955_v21  ;;  %2525 = vmatmul.msk.bf16.gmra.mxu0 %vm334_vm1, %v3253_v26 }
 0x137   : > { %2393 = vmatmul.msk.bf16.gmra.mxu2 %vm334_vm1, %v2955_v21 }
 0x138   : > { %2508 = vmatmul.msk.bf16.gmra.mxu3 %vm334_vm1, %v3253_v26 }
 0x13a   : > { %v726_v47 = vpop.f32.mrf.mxu2 }
 0x13b   : > { %v1062_v28 = vpop.f32.mrf.mxu3  ;;  %v1193_v43 = vpop.f32.mrf.mxu0  ;;  %v774_v12 = vrot.slane %v726_v47, 2 }
 0x13c   : > { %v551_v30 = vpop.f32.mrf.mxu1  ;;  %v1247_v51 = vrot.slane %v1193_v43, 1 }
 0x13d   : > { %v605_v50 = vrot.slane %v551_v30, 1 }
 0x13e   : > { %v1271_v56 = vsel %vm620_vm2, %v1239_v0, %v1247_v51  ;;  %v2731_v0 = vld [vmem:[%s2911_s7 + $0x20] sm:$0xff] }
 0x13f   : > { %v632_v55 = vsel %vm620_vm2, %v597_v13, %v605_v50 }
 0x140   : > { %v659_v38 = vadd.f32 %v632_v55, %v3088_v2 }
 0x142   : > { %v728_v21 = vpop.f32.mrf.mxu2 }
 0x143   : > { %v1064_v7 = vpop.f32.mrf.mxu3  ;;  %v782_v48 = vrot.slane %v728_v21, 2  ;;  %v1196_v60 = vpop.f32.mrf.mxu0 }
 0x144   : > { %v554_v42 = vpop.f32.mrf.mxu1  ;;  %v1255_v1 = vrot.slane %v1196_v60, 1 }
 0x145   : > { %v613_v62 = vrot.slane %v554_v42, 1  ;;  %v807_v4 = vsel %vm795_vm3, %v774_v12, %v782_v48 }
 0x146   : > { %v834_v10 = vadd.f32 %v807_v4, %v659_v38  ;;  %v1263_v2 = vsel %vm620_vm2, %v1247_v51, %v1255_v1  ;;  %2377 = vmatmul.msk.bf16.gmra.mxu1 %vm334_vm1, %v2988_v33  ;;  %2526 = vmatmul.msk.bf16.gmra.mxu0 %vm334_vm1, %v3271_v57  ;;  %v2732_v4 = vld [vmem:[%s2911_s7 + $0x28] sm:$0xff] }
 0x147   : > { %v624_v19 = vsel %vm620_vm2, %v605_v50, %v613_v62  ;;  %2394 = vmatmul.msk.bf16.gmra.mxu2 %vm334_vm1, %v2988_v33 }
 0x148   : > { %v660_v61 = vadd.f32 %v624_v19, %v3107_v9  ;;  %2509 = vmatmul.msk.bf16.gmra.mxu3 %vm334_vm1, %v3271_v57  ;;  %v1124_v22 = vadd.f32 %v1062_v28, %v834_v10 }
 0x14a   : > { %v731_v40 = vpop.f32.mrf.mxu2  ;;  %v3288_v49 = vadd.f32 %v1271_v56, %v1124_v22 }
 0x14b   : > { %v1067_v23 = vpop.f32.mrf.mxu3  ;;  %v790_v24 = vrot.slane %v731_v40, 2  ;;  %v1198_v20 = vpop.f32.mrf.mxu0 }
 0x14c   : > { %v556_v27 = vpop.f32.mrf.mxu1 }
 0x14d   : > { %v799_v47 = vsel %vm795_vm3, %v782_v48, %v790_v24 }
 0x14e   : > { %v835_v30 = vadd.f32 %v799_v47, %v660_v61 }
 0x150   : > { %v1125_v43 = vadd.f32 %v1064_v7, %v835_v30 }
 0x152   : > { %v733_v9 = vpop.f32.mrf.mxu2  ;;  %v3293_v33 = vadd.f32 %v1263_v2, %v1125_v43 }
 0x153   : > { %v1068_v13 = vpop.f32.mrf.mxu3  ;;  %v1200_v51 = vpop.f32.mrf.mxu0 }
 0x154   : > { %v558_v50 = vpop.f32.mrf.mxu1  ;;  %v1240_v7 = vrot.slane %v1200_v51, 1 }
 0x155   : > { %v598_v21 = vrot.slane %v558_v50, 1 }
 0x156   : > { %2528 = vmatmul.msk.bf16.vlgmr.msra.gmra.mxu1 %vm334_vm1, %v2998_v34  ;;  %2677 = vmatmul.msk.bf16.vlgmr.msra.gmra.mxu0 %vm334_vm1, %v2731_v0 }
 0x157   : > { %2643 = vmatmul.msk.bf16.vlgmr.msra.gmra.mxu2 %vm334_vm1, %v2731_v0 }
 0x158   : > { %2660 = vmatmul.msk.bf16.vlgmr.msra.gmra.mxu3 %vm334_vm1, %v2731_v0 }
 0x15a   : > { %v735_v28 = vpop.f32.mrf.mxu2 }
 0x15b   : > { %v1070_v55 = vpop.f32.mrf.mxu3  ;;  %v1202_v38 = vpop.f32.mrf.mxu0  ;;  %v775_v10 = vrot.slane %v735_v28, 2 }
 0x15c   : > { %v560_v56 = vpop.f32.mrf.mxu1  ;;  %v1248_v48 = vrot.slane %v1202_v38, 1 }
 0x15d   : > { %v606_v12 = vrot.slane %v560_v56, 1 }
 0x15e   : > { %v1272_v34 = vsel %vm620_vm2, %v1240_v7, %v1248_v48 }
 0x15f   : > { %v633_v42 = vsel %vm620_vm2, %v598_v21, %v606_v12 }
 0x160   : > { %v661_v60 = vadd.f32 %v633_v42, %v3055_v45 }
 0x162   : > { %v737_v62 = vpop.f32.mrf.mxu2 }
 0x163   : > { %v1072_v1 = vpop.f32.mrf.mxu3  ;;  %v783_v19 = vrot.slane %v737_v62, 2  ;;  %v1205_v61 = vpop.f32.mrf.mxu0 }
 0x164   : > { %v563_v2 = vpop.f32.mrf.mxu1  ;;  %v1256_v40 = vrot.slane %v1205_v61, 1 }
 0x165   : > { %v614_v22 = vrot.slane %v563_v2, 1  ;;  %v808_v23 = vsel %vm795_vm3, %v775_v10, %v783_v19 }
 0x166   : > { %v836_v24 = vadd.f32 %v808_v23, %v661_v60  ;;  %v1264_v20 = vsel %vm620_vm2, %v1248_v48, %v1256_v40  ;;  %2529 = vmatmul.msk.bf16.gmra.mxu1 %vm334_vm1, %v3007_v35  ;;  %2678 = vmatmul.msk.bf16.gmra.mxu0 %vm334_vm1, %v2732_v4 }
 0x167   : > { %v625_v27 = vsel %vm620_vm2, %v606_v12, %v614_v22  ;;  %2644 = vmatmul.msk.bf16.gmra.mxu2 %vm334_vm1, %v2732_v4  ;;  %v2734_v22 = vld [vmem:[%s2911_s7 + $0x38] sm:$0xff] }
 0x168   : > { %v662_v45 = vadd.f32 %v625_v27, %v3069_v53  ;;  %2661 = vmatmul.msk.bf16.gmra.mxu3 %vm334_vm1, %v2732_v4  ;;  %v1126_v47 = vadd.f32 %v1070_v55, %v836_v24  ;;  %v2733_v53 = vld [vmem:[%s2911_s7 + $0x30] sm:$0xff] }
 0x16a   : > { %v740_v30 = vpop.f32.mrf.mxu2  ;;  %v3318_v9 = vadd.f32 %v1272_v34, %v1126_v47 }
 0x16b   : > { %v1075_v43 = vpop.f32.mrf.mxu3  ;;  %v791_v13 = vrot.slane %v740_v30, 2  ;;  %v1207_v50 = vpop.f32.mrf.mxu0 }
 0x16c   : > { %v565_v0 = vpop.f32.mrf.mxu1 }
 0x16d   : > { %v800_v35 = vsel %vm795_vm3, %v783_v19, %v791_v13 }
 0x16e   : > { %v837_v51 = vadd.f32 %v800_v35, %v662_v45 }
 0x170   : > { %v1127_v28 = vadd.f32 %v1072_v1, %v837_v51 }
 0x172   : > { %v742_v56 = vpop.f32.mrf.mxu2  ;;  %v3323_v21 = vadd.f32 %v1264_v20, %v1127_v28 }
 0x173   : > { %v1076_v38 = vpop.f32.mrf.mxu3  ;;  %v1209_v12 = vpop.f32.mrf.mxu0 }
 0x174   : > { %v567_v7 = vpop.f32.mrf.mxu1  ;;  %v1241_v62 = vrot.slane %v1209_v12, 1 }
 0x175   : > { %v599_v60 = vrot.slane %v567_v7, 1 }
 0x176   : > { %2530 = vmatmul.msk.bf16.gmra.mxu1 %vm334_vm1, %v3016_v36  ;;  %2679 = vmatmul.msk.bf16.gmra.mxu0 %vm334_vm1, %v2733_v53 }
 0x177   : > { %2645 = vmatmul.msk.bf16.gmra.mxu2 %vm334_vm1, %v2733_v53 }
 0x178   : > { %2662 = vmatmul.msk.bf16.gmra.mxu3 %vm334_vm1, %v2733_v53 }
 0x17a   : > { %v744_v55 = vpop.f32.mrf.mxu2 }
 0x17b   : > { %v1078_v48 = vpop.f32.mrf.mxu3  ;;  %v1211_v34 = vpop.f32.mrf.mxu0  ;;  %v776_v40 = vrot.slane %v744_v55, 2 }
 0x17c   : > { %v569_v42 = vpop.f32.mrf.mxu1  ;;  %v1249_v4 = vrot.slane %v1211_v34, 1 }
 0x17d   : > { %v607_v1 = vrot.slane %v569_v42, 1 }
 0x17e   : > { %v1273_v36 = vsel %vm620_vm2, %v1241_v62, %v1249_v4 }
 0x17f   : > { %v634_v10 = vsel %vm620_vm2, %v599_v60, %v607_v1 }
 0x180   : > { %v663_v19 = vadd.f32 %v634_v10, %v3099_v5 }
 0x182   : > { %v746_v2 = vpop.f32.mrf.mxu2 }
 0x183   : > { %v1080_v61 = vpop.f32.mrf.mxu3  ;;  %v784_v23 = vrot.slane %v746_v2, 2  ;;  %v1214_v27 = vpop.f32.mrf.mxu0 }
 0x184   : > { %v572_v24 = vpop.f32.mrf.mxu1  ;;  %v1257_v45 = vrot.slane %v1214_v27, 1 }
 0x185   : > { %v615_v20 = vrot.slane %v572_v24, 1  ;;  %v809_v47 = vsel %vm795_vm3, %v776_v40, %v784_v23  ;;  %v2736_v24 = vld [vmem:[%s2911_s7 + $0x48] sm:$0xff] }
 0x186   : > { %v838_v30 = vadd.f32 %v809_v47, %v663_v19  ;;  %v1265_v13 = vsel %vm620_vm2, %v1249_v4, %v1257_v45  ;;  %2531 = vmatmul.msk.bf16.gmra.mxu1 %vm334_vm1, %v3025_v37  ;;  %2680 = vmatmul.msk.bf16.gmra.mxu0 %vm334_vm1, %v2734_v22 }
 0x187   : > { %v626_v43 = vsel %vm620_vm2, %v607_v1, %v615_v20  ;;  %2646 = vmatmul.msk.bf16.gmra.mxu2 %vm334_vm1, %v2734_v22 }
 0x188   : > { %v664_v5 = vadd.f32 %v626_v43, %v3113_v15  ;;  %2663 = vmatmul.msk.bf16.gmra.mxu3 %vm334_vm1, %v2734_v22  ;;  %v1128_v0 = vadd.f32 %v1078_v48, %v838_v30  ;;  %v2735_v15 = vld [vmem:[%s2911_s7 + $0x40] sm:$0xff] }
 0x18a   : > { %v749_v50 = vpop.f32.mrf.mxu2  ;;  %v3348_v51 = vadd.f32 %v1273_v36, %v1128_v0 }
 0x18b   : > { %v1083_v35 = vpop.f32.mrf.mxu3  ;;  %v792_v28 = vrot.slane %v749_v50, 2  ;;  %v1216_v38 = vpop.f32.mrf.mxu0 }
 0x18c   : > { %v574_v56 = vpop.f32.mrf.mxu1 }
 0x18d   : > { %v801_v37 = vsel %vm795_vm3, %v784_v23, %v792_v28 }
 0x18e   : > { %v839_v53 = vadd.f32 %v801_v37, %v664_v5 }
 0x190   : > { %v1129_v7 = vadd.f32 %v1080_v61, %v839_v53 }
 0x192   : > { %v751_v12 = vpop.f32.mrf.mxu2  ;;  %v3353_v42 = vadd.f32 %v1265_v13, %v1129_v7 }
 0x193   : > { %v1084_v55 = vpop.f32.mrf.mxu3  ;;  %v1218_v60 = vpop.f32.mrf.mxu0 }
 0x194   : > { %v576_v34 = vpop.f32.mrf.mxu1  ;;  %v1242_v36 = vrot.slane %v1218_v60, 1 }
 0x195   : > { %v600_v10 = vrot.slane %v576_v34, 1 }
 0x196   : > { %2532 = vmatmul.msk.bf16.gmra.mxu1 %vm334_vm1, %v3039_v39  ;;  %2681 = vmatmul.msk.bf16.gmra.mxu0 %vm334_vm1, %v2735_v15 }
 0x197   : > { %2647 = vmatmul.msk.bf16.gmra.mxu2 %vm334_vm1, %v2735_v15 }
 0x198   : > { %2664 = vmatmul.msk.bf16.gmra.mxu3 %vm334_vm1, %v2735_v15 }
 0x19a   : > { %v753_v48 = vpop.f32.mrf.mxu2 }
 0x19b   : > { %v1086_v62 = vpop.f32.mrf.mxu3  ;;  %v1220_v4 = vpop.f32.mrf.mxu0  ;;  %v777_v27 = vrot.slane %v753_v48, 2 }
 0x19c   : > { %v578_v1 = vpop.f32.mrf.mxu1  ;;  %v1250_v2 = vrot.slane %v1220_v4, 1 }
 0x19d   : > { %v608_v19 = vrot.slane %v578_v1, 1 }
 0x19e   : > { %v1274_v39 = vsel %vm620_vm2, %v1242_v36, %v1250_v2 }
 0x19f   : > { %v635_v61 = vsel %vm620_vm2, %v600_v10, %v608_v19 }
 0x1a0   : > { %v665_v22 = vadd.f32 %v635_v61, %v3058_v46 }
 0x1a2   : > { %v755_v40 = vpop.f32.mrf.mxu2 }
 0x1a3   : > { %v1088_v23 = vpop.f32.mrf.mxu3  ;;  %v785_v20 = vrot.slane %v755_v40, 2  ;;  %v1223_v47 = vpop.f32.mrf.mxu0 }
 0x1a4   : > { %v581_v45 = vpop.f32.mrf.mxu1  ;;  %v1258_v43 = vrot.slane %v1223_v47, 1 }
 0x1a5   : > { %v616_v30 = vrot.slane %v581_v45, 1  ;;  %v810_v13 = vsel %vm795_vm3, %v777_v27, %v785_v20  ;;  %v2738_v27 = vld [vmem:[%s2911_s7 + $0x58] sm:$0xff] }
 0x1a6   : > { %v840_v5 = vadd.f32 %v810_v13, %v665_v22  ;;  %v1266_v50 = vsel %vm620_vm2, %v1250_v2, %v1258_v43  ;;  %2533 = vmatmul.msk.bf16.gmra.mxu1 %vm334_vm1, %v3066_v52  ;;  %2682 = vmatmul.msk.bf16.gmra.mxu0 %vm334_vm1, %v2736_v24 }
 0x1a7   : > { %v627_v0 = vsel %vm620_vm2, %v608_v19, %v616_v30  ;;  %2648 = vmatmul.msk.bf16.gmra.mxu2 %vm334_vm1, %v2736_v24 }
 0x1a8   : > { %v666_v46 = vadd.f32 %v627_v0, %v3072_v54  ;;  %2665 = vmatmul.msk.bf16.gmra.mxu3 %vm334_vm1, %v2736_v24  ;;  %v1130_v35 = vadd.f32 %v1086_v62, %v840_v5  ;;  %v2737_v54 = vld [vmem:[%s2911_s7 + $0x50] sm:$0xff] }
 0x1aa   : > { %v758_v28 = vpop.f32.mrf.mxu2  ;;  %v3378_v38 = vadd.f32 %v1274_v39, %v1130_v35 }
 0x1ab   : > { %v1091_v56 = vpop.f32.mrf.mxu3  ;;  %v793_v37 = vrot.slane %v758_v28, 2  ;;  %v1225_v7 = vpop.f32.mrf.mxu0 }
 0x1ac   : > { %v583_v53 = vpop.f32.mrf.mxu1 }
 0x1ad   : > { %v802_v52 = vsel %vm795_vm3, %v785_v20, %v793_v37 }
 0x1ae   : > { %v841_v12 = vadd.f32 %v802_v52, %v666_v46 }
 0x1b0   : > { %v1131_v55 = vadd.f32 %v1088_v23, %v841_v12 }
 0x1b2   : > { %v760_v15 = vpop.f32.mrf.mxu2  ;;  %v3383_v60 = vadd.f32 %v1266_v50, %v1131_v55 }
 0x1b3   : > { %v1092_v34 = vpop.f32.mrf.mxu3  ;;  %v1227_v1 = vpop.f32.mrf.mxu0 }
 0x1b4   : > { %v585_v48 = vpop.f32.mrf.mxu1  ;;  %v1243_v2 = vrot.slane %v1227_v1, 1  ;;  %v2739_v34 = vld [vmem:[%s2911_s7 + $0x60] sm:$0xff] }
 0x1b5   : > { %v601_v19 = vrot.slane %v585_v48, 1 }
 0x1b6   : > { %2534 = vmatmul.msk.bf16.gmra.mxu1 %vm334_vm1, %v3083_v63  ;;  %2683 = vmatmul.msk.bf16.gmra.mxu0 %vm334_vm1, %v2737_v54 }
 0x1b7   : > { %2649 = vmatmul.msk.bf16.gmra.mxu2 %vm334_vm1, %v2737_v54 }
 0x1b8   : > { %2666 = vmatmul.msk.bf16.gmra.mxu3 %vm334_vm1, %v2737_v54 }
 0x1ba   : > { %v762_v62 = vpop.f32.mrf.mxu2 }
 0x1bb   : > { %v1094_v4 = vpop.f32.mrf.mxu3  ;;  %v1229_v36 = vpop.f32.mrf.mxu0  ;;  %v778_v20 = vrot.slane %v762_v62, 2 }
 0x1bc   : > { %v587_v10 = vpop.f32.mrf.mxu1  ;;  %v1251_v39 = vrot.slane %v1229_v36, 1 }
 0x1bd   : > { %v609_v61 = vrot.slane %v587_v10, 1 }
 0x1be   : > { %v1275_v63 = vsel %vm620_vm2, %v1243_v2, %v1251_v39 }
 0x1bf   : > { %v636_v22 = vsel %vm620_vm2, %v601_v19, %v609_v61 }
 0x1c0   : > { %v667_v40 = vadd.f32 %v636_v22, %v3102_v6 }
 0x1c2   : > { %v764_v23 = vpop.f32.mrf.mxu2 }
 0x1c3   : > { %v1096_v24 = vpop.f32.mrf.mxu3  ;;  %v786_v45 = vrot.slane %v764_v23, 2  ;;  %v1232_v30 = vpop.f32.mrf.mxu0 }
 0x1c4   : > { %v590_v47 = vpop.f32.mrf.mxu1  ;;  %v1259_v13 = vrot.slane %v1232_v30, 1 }
 0x1c5   : > { %v617_v43 = vrot.slane %v590_v47, 1  ;;  %v811_v5 = vsel %vm795_vm3, %v778_v20, %v786_v45 }
 0x1c6   : > { %v842_v0 = vadd.f32 %v811_v5, %v667_v40  ;;  %v1267_v46 = vsel %vm620_vm2, %v1251_v39, %v1259_v13  ;;  %2535 = vmatmul.msk.bf16.gmra.mxu1 %vm334_vm1, %v3110_v14  ;;  %2684 = vmatmul.msk.bf16.gmra.mxu0 %vm334_vm1, %v2738_v27 }
 0x1c7   : > { %v628_v50 = vsel %vm620_vm2, %v609_v61, %v617_v43  ;;  %2650 = vmatmul.msk.bf16.gmra.mxu2 %vm334_vm1, %v2738_v27 }
 0x1c8   : > { %v668_v6 = vadd.f32 %v628_v50, %v3116_v18  ;;  %2667 = vmatmul.msk.bf16.gmra.mxu3 %vm334_vm1, %v2738_v27  ;;  %v1132_v35 = vadd.f32 %v1094_v4, %v842_v0 }
 0x1ca   : > { %v767_v28 = vpop.f32.mrf.mxu2  ;;  %v3408_v37 = vadd.f32 %v1275_v63, %v1132_v35  ;;  %v2740_v63 = vld [vmem:[%s2911_s7 + $0x68] sm:$0xff] }
 0x1cb   : > { %v1099_v56 = vpop.f32.mrf.mxu3  ;;  %v794_v53 = vrot.slane %v767_v28, 2  ;;  %v1234_v52 = vpop.f32.mrf.mxu0 }
 0x1cc   : > { %v592_v7 = vpop.f32.mrf.mxu1 }
 0x1cd   : > { %v803_v14 = vsel %vm795_vm3, %v786_v45, %v794_v53 }
 0x1ce   : > { %v843_v12 = vadd.f32 %v803_v14, %v668_v6 }
 0x1d0   : > { %v1133_v55 = vadd.f32 %v1096_v24, %v843_v12 }
 0x1d2   : > { %v769_v15 = vpop.f32.mrf.mxu2  ;;  %v3413_v54 = vadd.f32 %v1267_v46, %v1133_v55 }
 0x1d3   : > { %v1100_v18 = vpop.f32.mrf.mxu3  ;;  %v1976_v1 = vpop.f32.mrf.mxu0  ;;  %v2741_v15 = vld [vmem:[%s2911_s7 + $0x70] sm:$0xff] }
 0x1d4   : > { %v1338_v48 = vpop.f32.mrf.mxu1  ;;  %v2048_v30 = vrot.slane %v1976_v1, 2 }
 0x1d5   : > { %v1410_v19 = vrot.slane %v1338_v48, 2 }
 0x1d6   : > { %2536 = vmatmul.msk.bf16.gmra.mxu1 %vm334_vm1, %v3127_v29  ;;  %2685 = vmatmul.msk.bf16.gmra.mxu0 %vm334_vm1, %v2739_v34 }
 0x1d7   : > { %2651 = vmatmul.msk.bf16.gmra.mxu2 %vm334_vm1, %v2739_v34 }
 0x1d8   : > { %2668 = vmatmul.msk.bf16.gmra.mxu3 %vm334_vm1, %v2739_v34 }
 0x1da   : > { %v1676_v62 = vpop.f32.mrf.mxu2 }
 0x1db   : > { %v1802_v4 = vpop.f32.mrf.mxu3  ;;  %v1978_v36 = vpop.f32.mrf.mxu0 }
 0x1dc   : > { %v1340_v10 = vpop.f32.mrf.mxu1  ;;  %v1874_v40 = vrot.slane %v1802_v4, 1  ;;  %v2056_v23 = vrot.slane %v1978_v36, 2 }
 0x1dd   : > { %v1418_v2 = vrot.slane %v1340_v10, 2 }
 0x1de   : > { %v2080_v5 = vsel %vm795_vm3, %v2048_v30, %v2056_v23 }
 0x1df   : > { %v1442_v61 = vsel %vm795_vm3, %v1410_v19, %v1418_v2 }
 0x1e0   : > { %v1466_v29 = vadd.f32 %v1442_v61, %v3166_v41 }
 0x1e2   : > { %v1678_v39 = vpop.f32.mrf.mxu2  ;;  %v1756_v45 = vadd.f32 %v1676_v62, %v1466_v29 }
 0x1e3   : > { %v1804_v22 = vpop.f32.mrf.mxu3  ;;  %v1981_v20 = vpop.f32.mrf.mxu0 }
 0x1e4   : > { %v1882_v24 = vrot.slane %v1804_v22, 1  ;;  %v1343_v27 = vpop.f32.mrf.mxu1  ;;  %v2064_v6 = vrot.slane %v1981_v20, 2 }
 0x1e5   : > { %v1426_v47 = vrot.slane %v1343_v27, 2 }
 0x1e6   : > { %v1906_v43 = vsel %vm620_vm2, %v1874_v40, %v1882_v24  ;;  %2537 = vmatmul.msk.bf16.gmra.mxu1 %vm334_vm1, %v3148_v3  ;;  %2686 = vmatmul.msk.bf16.gmra.mxu0 %vm334_vm1, %v2740_v63  ;;  %v2072_v14 = vsel %vm795_vm3, %v2056_v23, %v2064_v6 }
 0x1e7   : > { %v1930_v13 = vadd.f32 %v1906_v43, %v1756_v45  ;;  %v1434_v41 = vsel %vm795_vm3, %v1418_v2, %v1426_v47  ;;  %2652 = vmatmul.msk.bf16.gmra.mxu2 %vm334_vm1, %v2740_v63 }
 0x1e8   : > { %2669 = vmatmul.msk.bf16.gmra.mxu3 %vm334_vm1, %v2740_v63  ;;  %v1467_v50 = vadd.f32 %v1434_v41, %v3173_v16 }
 0x1e9   : > { %v2104_v0 = vadd.f32 %v2080_v5, %v1930_v13 }
 0x1ea   : > { %v1681_v3 = vpop.f32.mrf.mxu2  ;;  %v1757_v53 = vadd.f32 %v1678_v39, %v1467_v50 }
 0x1eb   : > { %2152 = vst [vmem:[%s3438_s30] sm:$0xff] %v2104_v0  ;;  %v1807_v46 = vpop.f32.mrf.mxu3  ;;  %v1983_v56 = vpop.f32.mrf.mxu0 }
 0x1ec   : > { %v1890_v35 = vrot.slane %v1807_v46, 1  ;;  %v1345_v28 = vpop.f32.mrf.mxu1 }
 0x1ee   : > { %v1898_v7 = vsel %vm620_vm2, %v1882_v24, %v1890_v35 }
 0x1ef   : > { %v1931_v52 = vadd.f32 %v1898_v7, %v1757_v53  ;;  %v2743_v7 = vld [vmem:[%s2911_s7 + $0x80] sm:$0xff] }
 0x1f1   : > { %v2105_v12 = vadd.f32 %v2072_v14, %v1931_v52 }
 0x1f2   : > { %v1682_v55 = vpop.f32.mrf.mxu2 }
 0x1f3   : > { %2153 = vst [vmem:[%s3438_s30 + $0x8] sm:$0xff] %v2105_v12  ;;  %v1809_v16 = vpop.f32.mrf.mxu3  ;;  %v1985_v34 = vpop.f32.mrf.mxu0 }
 0x1f4   : > { %v1347_v18 = vpop.f32.mrf.mxu1  ;;  %v2049_v20 = vrot.slane %v1985_v34, 2 }
 0x1f5   : > { %v1411_v10 = vrot.slane %v1347_v18, 2 }
 0x1f6   : > { %2538 = vmatmul.msk.bf16.gmra.mxu1 %vm334_vm1, %v3171_v59  ;;  %2687 = vmatmul.msk.bf16.gmra.mxu0 %vm334_vm1, %v2741_v15  ;;  %v2742_v59 = vld [vmem:[%s2911_s7 + $0x78] sm:$0xff] }
 0x1f7   : > { %2653 = vmatmul.msk.bf16.gmra.mxu2 %vm334_vm1, %v2741_v15 }
 0x1f8   : > { %2670 = vmatmul.msk.bf16.gmra.mxu3 %vm334_vm1, %v2741_v15 }
 0x1fa   : > { %v1684_v48 = vpop.f32.mrf.mxu2 }
 0x1fb   : > { %v1811_v1 = vpop.f32.mrf.mxu3  ;;  %v1987_v4 = vpop.f32.mrf.mxu0 }
 0x1fc   : > { %v1349_v62 = vpop.f32.mrf.mxu1  ;;  %v1875_v39 = vrot.slane %v1811_v1, 1  ;;  %v2057_v22 = vrot.slane %v1987_v4, 2 }
 0x1fd   : > { %v1419_v36 = vrot.slane %v1349_v62, 2 }
 0x1ff   : > { %v1443_v19 = vsel %vm795_vm3, %v1411_v10, %v1419_v36 }
 0x200   : > { %v1468_v2 = vadd.f32 %v1443_v19, %v3208_v58  ;;  %v2081_v58 = vsel %vm795_vm3, %v2049_v20, %v2057_v22 }
 0x202   : > { %v1686_v61 = vpop.f32.mrf.mxu2  ;;  %v1758_v24 = vadd.f32 %v1684_v48, %v1468_v2 }
 0x203   : > { %v1813_v29 = vpop.f32.mrf.mxu3  ;;  %v1990_v23 = vpop.f32.mrf.mxu0 }
 0x204   : > { %v1883_v63 = vrot.slane %v1813_v29, 1  ;;  %v1352_v40 = vpop.f32.mrf.mxu1  ;;  %v2065_v0 = vrot.slane %v1990_v23, 2 }
 0x205   : > { %v1427_v27 = vrot.slane %v1352_v40, 2 }
 0x206   : > { %v1907_v45 = vsel %vm620_vm2, %v1875_v39, %v1883_v63  ;;  %2539 = vmatmul.msk.bf16.gmra.mxu1 %vm334_vm1, %v3190_v25  ;;  %2688 = vmatmul.msk.bf16.gmra.mxu0 %vm334_vm1, %v2742_v59  ;;  %v2073_v28 = vsel %vm795_vm3, %v2057_v22, %v2065_v0 }
 0x207   : > { %v1932_v47 = vadd.f32 %v1907_v45, %v1758_v24  ;;  %v1435_v30 = vsel %vm795_vm3, %v1419_v36, %v1427_v27  ;;  %2654 = vmatmul.msk.bf16.gmra.mxu2 %vm334_vm1, %v2742_v59 }
 0x208   : > { %2671 = vmatmul.msk.bf16.gmra.mxu3 %vm334_vm1, %v2742_v59  ;;  %v1469_v13 = vadd.f32 %v1435_v30, %v3215_v32 }
 0x209   : > { %v2106_v43 = vadd.f32 %v2081_v58, %v1932_v47 }
 0x20a   : > { %v1689_v41 = vpop.f32.mrf.mxu2  ;;  %v1759_v46 = vadd.f32 %v1686_v61, %v1469_v13 }
 0x20b   : > { %2154 = vst [vmem:[%s3438_s30 + $0x10] sm:$0xff] %v2106_v43  ;;  %v1816_v5 = vpop.f32.mrf.mxu3  ;;  %v1992_v3 = vpop.f32.mrf.mxu0 }
 0x20c   : > { %v1891_v50 = vrot.slane %v1816_v5, 1  ;;  %v1354_v25 = vpop.f32.mrf.mxu1 }
 0x20e   : > { %v1899_v6 = vsel %vm620_vm2, %v1883_v63, %v1891_v50  ;;  %v2745_v50 = vld [vmem:[%s2911_s7 + $0x90] sm:$0xff] }
 0x20f   : > { %v1933_v35 = vadd.f32 %v1899_v6, %v1759_v46 }
 0x211   : > { %v2107_v56 = vadd.f32 %v2073_v28, %v1933_v35 }
 0x212   : > { %v1690_v53 = vpop.f32.mrf.mxu2 }
 0x213   : > { %2155 = vst [vmem:[%s3438_s30 + $0x18] sm:$0xff] %v2107_v56  ;;  %v1818_v32 = vpop.f32.mrf.mxu3  ;;  %v1994_v14 = vpop.f32.mrf.mxu0 }
 0x214   : > { %v1356_v52 = vpop.f32.mrf.mxu1  ;;  %v2050_v39 = vrot.slane %v1994_v14, 2 }
 0x215   : > { %v1412_v18 = vrot.slane %v1356_v52, 2 }
 0x216   : > { %2540 = vmatmul.msk.bf16.gmra.mxu1 %vm334_vm1, %v3213_v11  ;;  %2689 = vmatmul.msk.bf16.gmra.mxu0 %vm334_vm1, %v2743_v7  ;;  %v2744_v11 = vld [vmem:[%s2911_s7 + $0x88] sm:$0xff] }
 0x217   : > { %2655 = vmatmul.msk.bf16.gmra.mxu2 %vm334_vm1, %v2743_v7 }
 0x218   : > { %2672 = vmatmul.msk.bf16.gmra.mxu3 %vm334_vm1, %v2743_v7 }
 0x21a   : > { %v1692_v12 = vpop.f32.mrf.mxu2 }
 0x21b   : > { %v1820_v55 = vpop.f32.mrf.mxu3  ;;  %v1996_v15 = vpop.f32.mrf.mxu0 }
 0x21c   : > { %v1358_v16 = vpop.f32.mrf.mxu1  ;;  %v1876_v10 = vrot.slane %v1820_v55, 1  ;;  %v2058_v36 = vrot.slane %v1996_v15, 2 }
 0x21d   : > { %v1420_v34 = vrot.slane %v1358_v16, 2 }
 0x21f   : > { %v1444_v48 = vsel %vm795_vm3, %v1412_v18, %v1420_v34 }
 0x220   : > { %v1470_v1 = vadd.f32 %v1444_v48, %v3248_v8  ;;  %v2082_v8 = vsel %vm795_vm3, %v2050_v39, %v2058_v36 }
 0x222   : > { %v1694_v62 = vpop.f32.mrf.mxu2  ;;  %v1760_v29 = vadd.f32 %v1692_v12, %v1470_v1 }
 0x223   : > { %v1822_v4 = vpop.f32.mrf.mxu3  ;;  %v1999_v61 = vpop.f32.mrf.mxu0 }
 0x224   : > { %v1884_v19 = vrot.slane %v1822_v4, 1  ;;  %v1361_v2 = vpop.f32.mrf.mxu1  ;;  %v2066_v45 = vrot.slane %v1999_v61, 2 }
 0x225   : > { %v1428_v59 = vrot.slane %v1361_v2, 2 }
 0x226   : > { %v1908_v22 = vsel %vm620_vm2, %v1876_v10, %v1884_v19  ;;  %2541 = vmatmul.msk.bf16.gmra.mxu1 %vm334_vm1, %v3231_v44  ;;  %2690 = vmatmul.msk.bf16.gmra.mxu0 %vm334_vm1, %v2744_v11  ;;  %v2074_v41 = vsel %vm795_vm3, %v2058_v36, %v2066_v45 }
 0x227   : > { %v1934_v63 = vadd.f32 %v1908_v22, %v1760_v29  ;;  %v1436_v40 = vsel %vm795_vm3, %v1420_v34, %v1428_v59  ;;  %2656 = vmatmul.msk.bf16.gmra.mxu2 %vm334_vm1, %v2744_v11 }
 0x228   : > { %2673 = vmatmul.msk.bf16.gmra.mxu3 %vm334_vm1, %v2744_v11  ;;  %v1471_v24 = vadd.f32 %v1436_v40, %v3255_v17 }
 0x229   : > { %v2108_v23 = vadd.f32 %v2082_v8, %v1934_v63 }
 0x22a   : > { %v1697_v27 = vpop.f32.mrf.mxu2  ;;  %v1761_v58 = vadd.f32 %v1694_v62, %v1471_v24 }
 0x22b   : > { %2156 = vst [vmem:[%s3438_s30 + $0x20] sm:$0xff] %v2108_v23  ;;  %v1825_v20 = vpop.f32.mrf.mxu3  ;;  %v2001_v30 = vpop.f32.mrf.mxu0 }
 0x22c   : > { %v1892_v47 = vrot.slane %v1825_v20, 1  ;;  %v1363_v44 = vpop.f32.mrf.mxu1 }
 0x22e   : > { %v1900_v43 = vsel %vm620_vm2, %v1884_v19, %v1892_v47 }
 0x22f   : > { %v1935_v13 = vadd.f32 %v1900_v43, %v1761_v58 }
 0x231   : > { %v2109_v5 = vadd.f32 %v2074_v41, %v1935_v13 }
 0x232   : > { %v1698_v0 = vpop.f32.mrf.mxu2 }
 0x233   : > { %2157 = vst [vmem:[%s3438_s30 + $0x28] sm:$0xff] %v2109_v5  ;;  %v1827_v17 = vpop.f32.mrf.mxu3  ;;  %v2003_v3 = vpop.f32.mrf.mxu0 }
 0x234   : > { %v1365_v25 = vpop.f32.mrf.mxu1  ;;  %v2051_v1 = vrot.slane %v2003_v3, 2 }
 0x235   : > { %v1413_v56 = vrot.slane %v1365_v25, 2 }
 0x236   : > { %2542 = vmatmul.msk.bf16.gmra.mxu1 %vm334_vm1, %v3253_v26  ;;  %2691 = vmatmul.msk.bf16.gmra.mxu0 %vm334_vm1, %v2745_v50  ;;  %v2746_v26 = vld [vmem:[%s2911_s7 + $0x98] sm:$0xff] }
 0x237   : > { %2657 = vmatmul.msk.bf16.gmra.mxu2 %vm334_vm1, %v2745_v50 }
 0x238   : > { %2674 = vmatmul.msk.bf16.gmra.mxu3 %vm334_vm1, %v2745_v50 }
 0x23a   : > { %v1700_v46 = vpop.f32.mrf.mxu2 }
 0x23b   : > { %v1829_v6 = vpop.f32.mrf.mxu3  ;;  %v2005_v28 = vpop.f32.mrf.mxu0 }
 0x23c   : > { %v1367_v35 = vpop.f32.mrf.mxu1  ;;  %v1877_v12 = vrot.slane %v1829_v6, 1  ;;  %v2059_v55 = vrot.slane %v2005_v28, 2 }
 0x23d   : > { %v1421_v53 = vrot.slane %v1367_v35, 2 }
 0x23f   : > { %v1445_v32 = vsel %vm795_vm3, %v1413_v56, %v1421_v53 }
 0x240   : > { %v1472_v7 = vadd.f32 %v1445_v32, %v3288_v49  ;;  %v2083_v49 = vsel %vm795_vm3, %v2051_v1, %v2059_v55 }
 0x242   : > { %v1702_v52 = vpop.f32.mrf.mxu2  ;;  %v1762_v34 = vadd.f32 %v1700_v46, %v1472_v7 }
 0x243   : > { %v1831_v14 = vpop.f32.mrf.mxu3  ;;  %v2008_v18 = vpop.f32.mrf.mxu0 }
 0x244   : > { %v1885_v16 = vrot.slane %v1831_v14, 1  ;;  %v1370_v15 = vpop.f32.mrf.mxu1  ;;  %v2067_v61 = vrot.slane %v2008_v18, 2 }
 0x245   : > { %v1429_v48 = vrot.slane %v1370_v15, 2 }
 0x246   : > { %v1909_v62 = vsel %vm620_vm2, %v1877_v12, %v1885_v16  ;;  %2543 = vmatmul.msk.bf16.gmra.mxu1 %vm334_vm1, %v3271_v57  ;;  %2692 = vmatmul.msk.bf16.gmra.mxu0 %vm334_vm1, %v2746_v26  ;;  %v2075_v40 = vsel %vm795_vm3, %v2059_v55, %v2067_v61 }
 0x247   : > { %v1936_v4 = vadd.f32 %v1909_v62, %v1762_v34  ;;  %v1437_v11 = vsel %vm795_vm3, %v1421_v53, %v1429_v48  ;;  %2658 = vmatmul.msk.bf16.gmra.mxu2 %vm334_vm1, %v2746_v26 }
 0x248   : > { %2675 = vmatmul.msk.bf16.gmra.mxu3 %vm334_vm1, %v2746_v26  ;;  %v1473_v36 = vadd.f32 %v1437_v11, %v3293_v33 }
 0x249   : > { %v2110_v10 = vadd.f32 %v2083_v49, %v1936_v4 }
 0x24a   : > { %v1705_v19 = vpop.f32.mrf.mxu2  ;;  %v1763_v39 = vadd.f32 %v1702_v52, %v1473_v36 }
 0x24b   : > { %2158 = vst [vmem:[%s3438_s30 + $0x30] sm:$0xff] %v2110_v10  ;;  %v1834_v2 = vpop.f32.mrf.mxu3  ;;  %v2010_v57 = vpop.f32.mrf.mxu0 }
 0x24c   : > { %v1893_v29 = vrot.slane %v1834_v2, 1  ;;  %v1372_v59 = vpop.f32.mrf.mxu1 }
 0x24e   : > { %v1901_v22 = vsel %vm620_vm2, %v1885_v16, %v1893_v29 }
 0x24f   : > { %v1937_v63 = vadd.f32 %v1901_v22, %v1763_v39 }
 0x251   : > { %v2111_v8 = vadd.f32 %v2075_v40, %v1937_v63 }
 0x252   : > { %v1706_v23 = vpop.f32.mrf.mxu2 }
 0x253   : > { %2159 = vst [vmem:[%s3438_s30 + $0x38] sm:$0xff] %v2111_v8  ;;  %v1836_v24 = vpop.f32.mrf.mxu3  ;;  %v2012_v27 = vpop.f32.mrf.mxu0 }
 0x254   : > { %v1374_v33 = vpop.f32.mrf.mxu1  ;;  %v2052_v35 = vrot.slane %v2012_v27, 2 }
 0x255   : > { %v1414_v30 = vrot.slane %v1374_v33, 2 }
 0x25a   : > { %v1708_v20 = vpop.f32.mrf.mxu2 }
 0x25b   : > { %v1838_v45 = vpop.f32.mrf.mxu3  ;;  %v2014_v44 = vpop.f32.mrf.mxu0 }
 0x25c   : > { %v1376_v47 = vpop.f32.mrf.mxu1  ;;  %v1878_v0 = vrot.slane %v1838_v45, 1  ;;  %v2060_v17 = vrot.slane %v2014_v44, 2 }
 0x25d   : > { %v1422_v58 = vrot.slane %v1376_v47, 2 }
 0x25f   : > { %v1446_v43 = vsel %vm795_vm3, %v1414_v30, %v1422_v58 }
 0x260   : > { %v1474_v13 = vadd.f32 %v1446_v43, %v3318_v9  ;;  %v2084_v9 = vsel %vm795_vm3, %v2052_v35, %v2060_v17 }
 0x262   : > { %v1710_v41 = vpop.f32.mrf.mxu2  ;;  %v1764_v46 = vadd.f32 %v1708_v20, %v1474_v13 }
 0x263   : > { %v1840_v5 = vpop.f32.mrf.mxu3  ;;  %v2017_v3 = vpop.f32.mrf.mxu0 }
 0x264   : > { %v1886_v50 = vrot.slane %v1840_v5, 1  ;;  %v1379_v25 = vpop.f32.mrf.mxu1  ;;  %v2068_v26 = vrot.slane %v2017_v3, 2 }
 0x265   : > { %v1430_v6 = vrot.slane %v1379_v25, 2 }
 0x266   : > { %v1910_v28 = vsel %vm620_vm2, %v1878_v0, %v1886_v50  ;;  %v2076_v48 = vsel %vm795_vm3, %v2060_v17, %v2068_v26 }
 0x267   : > { %v1938_v56 = vadd.f32 %v1910_v28, %v1764_v46  ;;  %v1438_v53 = vsel %vm795_vm3, %v1422_v58, %v1430_v6 }
 0x268   : > { %v1475_v7 = vadd.f32 %v1438_v53, %v3323_v21 }
 0x269   : > { %v2112_v32 = vadd.f32 %v2084_v9, %v1938_v56 }
 0x26a   : > { %v1713_v52 = vpop.f32.mrf.mxu2  ;;  %v1765_v15 = vadd.f32 %v1710_v41, %v1475_v7 }
 0x26b   : > { %2160 = vst [vmem:[%s3438_s30 + $0x40] sm:$0xff] %v2112_v32  ;;  %v1843_v14 = vpop.f32.mrf.mxu3  ;;  %v2019_v16 = vpop.f32.mrf.mxu0 }
 0x26c   : > { %v1894_v12 = vrot.slane %v1843_v14, 1  ;;  %v1381_v55 = vpop.f32.mrf.mxu1 }
 0x26e   : > { %v1902_v18 = vsel %vm620_vm2, %v1886_v50, %v1894_v12 }
 0x26f   : > { %v1939_v34 = vadd.f32 %v1902_v18, %v1765_v15 }
 0x271   : > { %v2113_v1 = vadd.f32 %v2076_v48, %v1939_v34 }
 0x272   : > { %v1714_v62 = vpop.f32.mrf.mxu2 }
 0x273   : > { %2161 = vst [vmem:[%s3438_s30 + $0x48] sm:$0xff] %v2113_v1  ;;  %v1845_v4 = vpop.f32.mrf.mxu3  ;;  %v2021_v11 = vpop.f32.mrf.mxu0 }
 0x274   : > { %v1383_v21 = vpop.f32.mrf.mxu1  ;;  %v2053_v27 = vrot.slane %v2021_v11, 2 }
 0x275   : > { %v1415_v2 = vrot.slane %v1383_v21, 2 }
 0x27a   : > { %v1716_v49 = vpop.f32.mrf.mxu2 }
 0x27b   : > { %v1847_v10 = vpop.f32.mrf.mxu3  ;;  %v2023_v19 = vpop.f32.mrf.mxu0 }
 0x27c   : > { %v1385_v36 = vpop.f32.mrf.mxu1  ;;  %v1879_v22 = vrot.slane %v1847_v10, 1  ;;  %v2061_v63 = vrot.slane %v2023_v19, 2 }
 0x27d   : > { %v1423_v61 = vrot.slane %v1385_v36, 2 }
 0x27f   : > { %v1447_v29 = vsel %vm795_vm3, %v1415_v2, %v1423_v61 }
 0x280   : > { %v1476_v59 = vadd.f32 %v1447_v29, %v3348_v51  ;;  %v2085_v51 = vsel %vm795_vm3, %v2053_v27, %v2061_v63 }
 0x282   : > { %v1718_v57 = vpop.f32.mrf.mxu2  ;;  %v1766_v24 = vadd.f32 %v1716_v49, %v1476_v59 }
 0x283   : > { %v1849_v39 = vpop.f32.mrf.mxu3  ;;  %v2026_v23 = vpop.f32.mrf.mxu0 }
 0x284   : > { %v1887_v40 = vrot.slane %v1849_v39, 1  ;;  %v1388_v8 = vpop.f32.mrf.mxu1  ;;  %v2069_v13 = vrot.slane %v2026_v23, 2 }
 0x285   : > { %v1431_v33 = vrot.slane %v1388_v8, 2 }
 0x286   : > { %v1911_v20 = vsel %vm620_vm2, %v1879_v22, %v1887_v40  ;;  %v2077_v3 = vsel %vm795_vm3, %v2061_v63, %v2069_v13 }
 0x287   : > { %v1940_v45 = vadd.f32 %v1911_v20, %v1766_v24  ;;  %v1439_v47 = vsel %vm795_vm3, %v1423_v61, %v1431_v33 }
 0x288   : > { %v1477_v30 = vadd.f32 %v1439_v47, %v3353_v42 }
 0x289   : > { %v2114_v44 = vadd.f32 %v2085_v51, %v1940_v45 }
 0x28a   : > { %v1721_v58 = vpop.f32.mrf.mxu2  ;;  %v1767_v17 = vadd.f32 %v1718_v57, %v1477_v30 }
 0x28b   : > { %2162 = vst [vmem:[%s3438_s30 + $0x50] sm:$0xff] %v2114_v44  ;;  %v1852_v43 = vpop.f32.mrf.mxu3  ;;  %v2028_v0 = vpop.f32.mrf.mxu0 }
 0x28c   : > { %v1895_v41 = vrot.slane %v1852_v43, 1  ;;  %v1390_v5 = vpop.f32.mrf.mxu1 }
 0x28e   : > { %v1903_v50 = vsel %vm620_vm2, %v1887_v40, %v1895_v41 }
 0x28f   : > { %v1941_v25 = vadd.f32 %v1903_v50, %v1767_v17 }
 0x291   : > { %v2115_v46 = vadd.f32 %v2077_v3, %v1941_v25 }
 0x292   : > { %v1722_v6 = vpop.f32.mrf.mxu2 }
 0x293   : > { %2163 = vst [vmem:[%s3438_s30 + $0x58] sm:$0xff] %v2115_v46  ;;  %v1854_v35 = vpop.f32.mrf.mxu3  ;;  %v2030_v28 = vpop.f32.mrf.mxu0 }
 0x294   : > { %v1392_v42 = vpop.f32.mrf.mxu1  ;;  %v2054_v4 = vrot.slane %v2030_v28, 2 }
 0x295   : > { %v1416_v7 = vrot.slane %v1392_v42, 2 }
 0x29a   : > { %v1724_v56 = vpop.f32.mrf.mxu2 }
 0x29b   : > { %v1856_v53 = vpop.f32.mrf.mxu3  ;;  %v2032_v32 = vpop.f32.mrf.mxu0 }
 0x29c   : > { %v1394_v9 = vpop.f32.mrf.mxu1  ;;  %v1880_v16 = vrot.slane %v1856_v53, 1  ;;  %v2062_v15 = vrot.slane %v2032_v32, 2 }
 0x29d   : > { %v1424_v52 = vrot.slane %v1394_v9, 2 }
 0x29f   : > { %v1448_v14 = vsel %vm795_vm3, %v1416_v7, %v1424_v52 }
 0x2a0   : > { %v1478_v26 = vadd.f32 %v1448_v14, %v3378_v38  ;;  %v2086_v38 = vsel %vm795_vm3, %v2054_v4, %v2062_v15 }
 0x2a2   : > { %v1726_v12 = vpop.f32.mrf.mxu2  ;;  %v1768_v1 = vadd.f32 %v1724_v56, %v1478_v26 }
 0x2a3   : > { %v1858_v55 = vpop.f32.mrf.mxu3  ;;  %v2035_v48 = vpop.f32.mrf.mxu0 }
 0x2a4   : > { %v1888_v18 = vrot.slane %v1858_v55, 1  ;;  %v1397_v34 = vpop.f32.mrf.mxu1  ;;  %v2070_v61 = vrot.slane %v2035_v48, 2 }
 0x2a5   : > { %v1432_v62 = vrot.slane %v1397_v34, 2 }
 0x2a6   : > { %v1912_v21 = vsel %vm620_vm2, %v1880_v16, %v1888_v18  ;;  %v2078_v40 = vsel %vm795_vm3, %v2062_v15, %v2070_v61 }
 0x2a7   : > { %v1942_v11 = vadd.f32 %v1912_v21, %v1768_v1  ;;  %v1440_v49 = vsel %vm795_vm3, %v1424_v52, %v1432_v62 }
 0x2a8   : > { %v1479_v36 = vadd.f32 %v1440_v49, %v3383_v60 }
 0x2a9   : > { %v2116_v10 = vadd.f32 %v2086_v38, %v1942_v11 }
 0x2aa   : > { %v1729_v19 = vpop.f32.mrf.mxu2  ;;  %v1769_v39 = vadd.f32 %v1726_v12, %v1479_v36 }
 0x2ab   : > { %2164 = vst [vmem:[%s3438_s30 + $0x60] sm:$0xff] %v2116_v10  ;;  %v1861_v2 = vpop.f32.mrf.mxu3  ;;  %v2037_v57 = vpop.f32.mrf.mxu0 }
 0x2ac   : > { %v1896_v29 = vrot.slane %v1861_v2, 1  ;;  %v1399_v59 = vpop.f32.mrf.mxu1 }
 0x2ae   : > { %v1904_v22 = vsel %vm620_vm2, %v1888_v18, %v1896_v29 }
 0x2af   : > { %v1943_v63 = vadd.f32 %v1904_v22, %v1769_v39 }
 0x2b1   : > { %v2117_v8 = vadd.f32 %v2078_v40, %v1943_v63 }
 0x2b2   : > { %v1730_v23 = vpop.f32.mrf.mxu2 }
 0x2b3   : > { %2165 = vst [vmem:[%s3438_s30 + $0x68] sm:$0xff] %v2117_v8  ;;  %v1863_v24 = vpop.f32.mrf.mxu3  ;;  %v2039_v33 = vpop.f32.mrf.mxu0 }
 0x2b4   : > { %v1401_v60 = vpop.f32.mrf.mxu1  ;;  %v2055_v46 = vrot.slane %v2039_v33, 2 }
 0x2b5   : > { %v1417_v51 = vrot.slane %v1401_v60, 2 }
 0x2ba   : > { %v1732_v27 = vpop.f32.mrf.mxu2 }
 0x2bb   : > { %v1865_v20 = vpop.f32.mrf.mxu3  ;;  %v2041_v47 = vpop.f32.mrf.mxu0 }
 0x2bc   : > { %v1403_v45 = vpop.f32.mrf.mxu1  ;;  %v1881_v41 = vrot.slane %v1865_v20, 1  ;;  %v2063_v5 = vrot.slane %v2041_v47, 2 }
 0x2bd   : > { %v1425_v44 = vrot.slane %v1403_v45, 2 }
 0x2bf   : > { %v1449_v30 = vsel %vm795_vm3, %v1417_v51, %v1425_v44 }
 0x2c0   : > { %v1480_v58 = vadd.f32 %v1449_v30, %v3408_v37  ;;  %v2087_v37 = vsel %vm795_vm3, %v2055_v46, %v2063_v5 }
 0x2c2   : > { %v1734_v43 = vpop.f32.mrf.mxu2  ;;  %v1770_v25 = vadd.f32 %v1732_v27, %v1480_v58 }
 0x2c3   : > { %v1867_v13 = vpop.f32.mrf.mxu3  ;;  %v2044_v50 = vpop.f32.mrf.mxu0 }
 0x2c4   : > { %v1889_v0 = vrot.slane %v1867_v13, 1  ;;  %v1406_v17 = vpop.f32.mrf.mxu1  ;;  %v2071_v32 = vrot.slane %v2044_v50, 2 }
 0x2c5   : > { %v1433_v3 = vrot.slane %v1406_v17, 2 }
 0x2c6   : > { %v1913_v6 = vsel %vm620_vm2, %v1881_v41, %v1889_v0  ;;  %v2079_v16 = vsel %vm795_vm3, %v2063_v5, %v2071_v32 }
 0x2c7   : > { %v1944_v35 = vadd.f32 %v1913_v6, %v1770_v25  ;;  %v1441_v42 = vsel %vm795_vm3, %v1425_v44, %v1433_v3 }
 0x2c8   : > { %v1481_v56 = vadd.f32 %v1441_v42, %v3413_v54 }
 0x2c9   : > { %v2118_v28 = vadd.f32 %v2087_v37, %v1944_v35 }
 0x2ca   : > { %v1737_v53 = vpop.f32.mrf.mxu2  ;;  %v1771_v26 = vadd.f32 %v1734_v43, %v1481_v56 }
 0x2cb   : > { %2166 = vst [vmem:[%s3438_s30 + $0x70] sm:$0xff] %v2118_v28  ;;  %v1870_v9 = vpop.f32.mrf.mxu3  ;;  %v2046_v14 = vpop.f32.mrf.mxu0 }
 0x2cc   : > { %v1897_v7 = vrot.slane %v1870_v9, 1  ;;  %v1408_v52 = vpop.f32.mrf.mxu1 }
 0x2ce   : > { %v1905_v12 = vsel %vm620_vm2, %v1889_v0, %v1897_v7 }
 0x2cf   : > { %v1945_v55 = vadd.f32 %v1905_v12, %v1771_v26 }
 0x2d1   : > { %v2119_v15 = vadd.f32 %v2079_v16, %v1945_v55 }
 0x2d2   : > { %v1738_v18 = vpop.f32.mrf.mxu2 }
 0x2d3   : > { %2167 = vst [vmem:[%s3438_s30 + $0x78] sm:$0xff] %v2119_v15  ;;  %v1872_v34 = vpop.f32.mrf.mxu3 }
 0x2d4 PF: > { %s13_s16 = sadd.s32 1, %s2830_s16   ;;  %s3616_s12 = smov %s2822_s14 }
 0x2d5   : > { %p10_p7 = scmp.ge.s32.totalorder %s13_s16, 6   ;;  %s3617_s13 = smov %s2826_s15 }
 0x2d6   : > { %s3618_s14 = smov %s3621_s17  ;;  %s3619_s15 = smov %s3625_s18 }
 0x2d7   :  { %12 = sbr.rel (!%p10_p7) target bundleno = 3 (0x3), region = 73 }

</bundles_post_ra>
